<compile_context>
chip_gen: v6e
topology: v6e:2x2x1
jax: 0.10.0
libtpu: 0.0.40
codegen_flags: <defaults>
</compile_context>

<pallas_src>
import functools

import jax
import jax.numpy as jnp
from jax import lax
from jax.experimental import pallas as pl
from jax.experimental.pallas import tpu as pltpu


def _round_up(x, m):
    return (x + m - 1) // m * m


# ----------------------------------------------------------------------------
# Pallas kernel: fused  (Cout,K)@(K,TM)  *scale + shift  [+ ReLU]
# lane axis = TM (spatial, 128-multiple)  -> lane-dense stores, full MXU N-dim
# ----------------------------------------------------------------------------
def _fused_matmul_kernel(w_ref, x_ref, scale_ref, shift_ref, o_ref, *, relu):
    # w_ref: (Cout, K)  x_ref: (K, TM)  scale/shift: (Cout, 1)  o_ref: (Cout, TM)
    y = jnp.dot(w_ref[...], x_ref[...], preferred_element_type=jnp.float32)
    y = y * scale_ref[...] + shift_ref[...]          # per-sublane (channel) affine
    if relu:
        y = jnp.maximum(y, 0.0)
    o_ref[...] = y.astype(o_ref.dtype)


def fused_conv_matmul(cols_t, w_t, scale, shift, *, relu,
                      compute_dtype=jnp.float32, tm_target=512):
    """cols_t: (K, NM) im2col matrix (column-major over outputs),
       w_t: (Cout, K), scale/shift: (Cout,). Returns (Cout, NM) f32."""
    K, NM = cols_t.shape
    Cout = w_t.shape[0]
    esize = jnp.dtype(compute_dtype).itemsize
    k_align = 8 if esize >= 4 else 16           # sublane alignment (f32 / bf16)
    K_pad = _round_up(K, k_align)

    # Pick TM: lane-dense (multiple of 128), shrink until the working set
    # (double-buffered cols + resident weight + double-buffered out) fits a
    # conservative VMEM budget that also holds on v7x (64 MiB physical).
    def tile_bytes(tm_):
        return (2 * K_pad * tm_ * esize          # cols, double-buffered
                + 2 * Cout * K_pad * esize       # weight (resident, 2 bufs)
                + 2 * Cout * tm_ * 4             # out f32, double-buffered
                + 4 * Cout * 4)                  # scale / shift
    vmem_budget = 20 * 1024 * 1024
    tm = min(_round_up(tm_target, 128), _round_up(NM, 128))
    while tm > 128 and tile_bytes(tm) > vmem_budget:
        tm -= 128

    NM_pad = _round_up(NM, tm)
    if K_pad != K or NM_pad != NM:
        cols_t = jnp.pad(cols_t, ((0, K_pad - K), (0, NM_pad - NM)))
        w_t = jnp.pad(w_t, ((0, 0), (0, K_pad - K)))

    cols_t = cols_t.astype(compute_dtype)
    w_t = w_t.astype(compute_dtype)
    scale2 = scale.reshape(Cout, 1).astype(jnp.float32)
    shift2 = shift.reshape(Cout, 1).astype(jnp.float32)

    num_tiles = NM_pad // tm
    vmem_limit = min(32 * 1024 * 1024, max(8 * 1024 * 1024, 2 * tile_bytes(tm)))

    kernel = functools.partial(_fused_matmul_kernel, relu=relu)
    out = pl.pallas_call(
        kernel,
        out_shape=jax.ShapeDtypeStruct((Cout, NM_pad), jnp.float32),
        grid_spec=pltpu.PrefetchScalarGridSpec(
            num_scalar_prefetch=0,
            grid=(num_tiles,),
            in_specs=[
                pl.BlockSpec((Cout, K_pad), lambda t: (0, 0)),   # weight (resident)
                pl.BlockSpec((K_pad, tm), lambda t: (0, t)),     # cols tile
                pl.BlockSpec((Cout, 1), lambda t: (0, 0)),       # scale
                pl.BlockSpec((Cout, 1), lambda t: (0, 0)),       # shift
            ],
            out_specs=pl.BlockSpec((Cout, tm), lambda t: (0, t)),
        ),
        compiler_params=pltpu.CompilerParams(
            dimension_semantics=("parallel",),
            vmem_limit_bytes=int(vmem_limit)),
    )(w_t, cols_t, scale2, shift2)
    return out[:, :NM]


# ----------------------------------------------------------------------------
# JAX glue: channel-major im2col + weight packing
# ----------------------------------------------------------------------------
def im2col_3d_cm(x_cm, ksize, stride, pad):
    """x_cm: (C, N, D, H, W) -> (ksize^3*C, N*Do*Ho*Wo), (Do, Ho, Wo).
       K ordering is tap-major, channel-minor."""
    C, N, D, H, W = x_cm.shape
    if pad:
        x_cm = jnp.pad(x_cm, ((0, 0), (0, 0),
                              (pad, pad), (pad, pad), (pad, pad)))
    Do = (D + 2 * pad - ksize) // stride + 1
    Ho = (H + 2 * pad - ksize) // stride + 1
    Wo = (W + 2 * pad - ksize) // stride + 1
    slices = []
    for kd in range(ksize):
        for kh in range(ksize):
            for kw in range(ksize):
                s = x_cm[:, :,
                         kd:kd + stride * Do:stride,
                         kh:kh + stride * Ho:stride,
                         kw:kw + stride * Wo:stride]
                slices.append(s.reshape(C, N * Do * Ho * Wo))
    cols = jnp.concatenate(slices, axis=0)   # (ksize^3*C, NM)
    return cols, (Do, Ho, Wo)


def pack_weight_t(w_pt):
    """PyTorch (Cout, Cin, kd, kh, kw) -> (Cout, kd*kh*kw*Cin)."""
    cout, cin, kd, kh, kw = w_pt.shape
    return jnp.transpose(w_pt, (0, 2, 3, 4, 1)).reshape(cout, kd * kh * kw * cin)


def conv_bn_relu_cm(x_cm, w_pt, bias, bn=None, *, ksize, stride, pad, relu,
                    compute_dtype=jnp.float32):
    """x_cm: (Cin, N, D, H, W) -> (Cout, N, Do, Ho, Wo)."""
    _, N = x_cm.shape[0], x_cm.shape[1]
    cols, (Do, Ho, Wo) = im2col_3d_cm(x_cm, ksize, stride, pad)
    w_t = pack_weight_t(w_pt)
    cout = w_t.shape[0]
    if bn is None:
        scale = jnp.ones((cout,), jnp.float32)
        shift = bias.astype(jnp.float32)
    else:
        gamma, beta, mean, var, eps = bn
        scale = gamma / jnp.sqrt(var + eps)
        shift = (bias - mean) * scale + beta
    y = fused_conv_matmul(cols, w_t, scale, shift, relu=relu,
                          compute_dtype=compute_dtype)       # (Cout, NM)
    return y.reshape(cout, N, Do, Ho, Wo)


# ----------------------------------------------------------------------------
# DownSamplingBlock forward (NCDHW in / NCDHW out, like PyTorch)
# ----------------------------------------------------------------------------
def downsampling_block_forward(x_ncdhw, p, *, compute_dtype=jnp.float32):
    x = jnp.transpose(x_ncdhw, (1, 0, 2, 3, 4))      # -> (C, N, D, H, W)
    # Dropout3d(0.001) -> identity (eval)
    # Conv3d(in_ch, in_ch, 2, stride=2)
    x = conv_bn_relu_cm(x, p["down_w"], p["down_b"], None,
                        ksize=2, stride=2, pad=0, relu=False,
                        compute_dtype=compute_dtype)
    # ConvBlock: conv1 -> bn1 -> relu -> conv2 -> bn2 -> relu
    x = conv_bn_relu_cm(x, p["w1"], p["b1"],
                        (p["g1"], p["be1"], p["m1"], p["v1"], 1e-5),
                        ksize=3, stride=1, pad=1, relu=True,
                        compute_dtype=compute_dtype)
    x = conv_bn_relu_cm(x, p["w2"], p["b2"],
                        (p["g2"], p["be2"], p["m2"], p["v2"], 1e-5),
                        ksize=3, stride=1, pad=1, relu=True,
                        compute_dtype=compute_dtype)
    return jnp.transpose(x, (1, 0, 2, 3, 4))         # -> (N, C, D, H, W)


# ----------------------------------------------------------------------------
# Pure-JAX reference (lax.conv) for correctness check
# ----------------------------------------------------------------------------
def _conv3d_ref(x_ndhwc, w_pt, bias, stride, padding):
    w = jnp.transpose(w_pt, (2, 3, 4, 1, 0))  # DHWIO
    dn = lax.conv_dimension_numbers(x_ndhwc.shape, w.shape,
                                    ("NDHWC", "DHWIO", "NDHWC"))
    y = lax.conv_general_dilated(x_ndhwc, w, (stride,) * 3, padding,
                                 dimension_numbers=dn)
    return y + bias


def _bn_relu_ref(x, gamma, beta, mean, var, eps=1e-5):
    y = (x - mean) / jnp.sqrt(var + eps) * gamma + beta
    return jnp.maximum(y, 0.0)


def reference_forward(x_ncdhw, p):
    x = jnp.transpose(x_ncdhw, (0, 2, 3, 4, 1))
    x = _conv3d_ref(x, p["down_w"], p["down_b"], 2, "VALID")
    x = _conv3d_ref(x, p["w1"], p["b1"], 1, [(1, 1)] * 3)
    x = _bn_relu_ref(x, p["g1"], p["be1"], p["m1"], p["v1"])
    x = _conv3d_ref(x, p["w2"], p["b2"], 1, [(1, 1)] * 3)
    x = _bn_relu_ref(x, p["g2"], p["be2"], p["m2"], p["v2"])
    return jnp.transpose(x, (0, 4, 1, 2, 3))


# ----------------------------------------------------------------------------
if __name__ == "__main__":
    key = jax.random.PRNGKey(0)
    in_ch, out_ch = 4, 8
    N, D, H, W = 2, 16, 16, 16

    keys = jax.random.split(key, 16)
    f32 = jnp.float32
    params = {
        # Conv3d(in_ch, in_ch, 2, stride=2)
        "down_w": 0.1 * jax.random.normal(keys[0], (in_ch, in_ch, 2, 2, 2), f32),
        "down_b": 0.1 * jax.random.normal(keys[1], (in_ch,), f32),
        # Conv3d(in_ch, out_ch, 3, pad=1) + BN
        "w1": 0.1 * jax.random.normal(keys[2], (out_ch, in_ch, 3, 3, 3), f32),
        "b1": 0.1 * jax.random.normal(keys[3], (out_ch,), f32),
        "g1": 1.0 + 0.1 * jax.random.normal(keys[4], (out_ch,), f32),
        "be1": 0.1 * jax.random.normal(keys[5], (out_ch,), f32),
        "m1": 0.1 * jax.random.normal(keys[6], (out_ch,), f32),
        "v1": 1.0 + 0.1 * jnp.abs(jax.random.normal(keys[7], (out_ch,), f32)),
        # Conv3d(out_ch, out_ch, 3, pad=1) + BN
        "w2": 0.1 * jax.random.normal(keys[8], (out_ch, out_ch, 3, 3, 3), f32),
        "b2": 0.1 * jax.random.normal(keys[9], (out_ch,), f32),
        "g2": 1.0 + 0.1 * jax.random.normal(keys[10], (out_ch,), f32),
        "be2": 0.1 * jax.random.normal(keys[11], (out_ch,), f32),
        "m2": 0.1 * jax.random.normal(keys[12], (out_ch,), f32),
        "v2": 1.0 + 0.1 * jnp.abs(jax.random.normal(keys[13], (out_ch,), f32)),
    }

    x = jax.random.normal(keys[14], (N, in_ch, D, H, W), f32)

    out = jax.block_until_ready(
        jax.jit(downsampling_block_forward)(x, params))
    ref = jax.block_until_ready(jax.jit(reference_forward)(x, params))

    assert out.shape == (N, out_ch, D // 2, H // 2, W // 2), out.shape
    max_err = float(jnp.max(jnp.abs(out - ref)))
    assert max_err < 2e-4, f"max abs error {max_err}"
    print("KERNEL_OK")
</pallas_src>

<mosaic_0001>
module attributes {stable_mosaic.version = 11 : i64} {
  func.func @_fused_matmul_kernel(%arg0: i32, %arg1: memref<4x32xf32, #tpu.memory_space<vmem>>, %arg2: memref<32x512xf32, #tpu.memory_space<vmem>>, %arg3: memref<4x1xf32, #tpu.memory_space<vmem>>, %arg4: memref<4x1xf32, #tpu.memory_space<vmem>>, %arg5: memref<4x512xf32, #tpu.memory_space<vmem>>) attributes {dimension_semantics = [#tpu.dimension_semantics<parallel>], iteration_bounds = array<i64: 2>, scalar_prefetch = 0 : i64, scratch_operands = 0 : i64, tpu.core_type = #tpu.core_type<tc>, window_params = [{pipeline_mode = #tpu.pipeline_mode<synchronous>, transform_indices = @transform_0, window_bounds = array<i64: 4, 32>}, {transform_indices = @transform_1, window_bounds = array<i64: 32, 512>}, {pipeline_mode = #tpu.pipeline_mode<synchronous>, transform_indices = @transform_2, window_bounds = array<i64: 4, 1>}, {pipeline_mode = #tpu.pipeline_mode<synchronous>, transform_indices = @transform_3, window_bounds = array<i64: 4, 1>}, {transform_indices = @transform_4, window_bounds = array<i64: 4, 512>}]} {
    %c0 = arith.constant 0 : index
    %c0_0 = arith.constant 0 : index
    %0 = vector.load %arg1[%c0, %c0_0] : memref<4x32xf32, #tpu.memory_space<vmem>>, vector<4x32xf32>
    %c0_1 = arith.constant 0 : index
    %c0_2 = arith.constant 0 : index
    %1 = vector.load %arg2[%c0_1, %c0_2] : memref<32x512xf32, #tpu.memory_space<vmem>>, vector<32x512xf32>
    %cst = arith.constant dense<0.000000e+00> : vector<4x512xf32>
    %2 = tpu.matmul %0, %1, %cst {dimension_numbers = #tpu.dot_dimension_numbers<[1], [0], [0], [1], [0, 0, 1, 1], [], []>} : vector<4x32xf32>, vector<32x512xf32>, vector<4x512xf32> -> vector<4x512xf32>
    %c0_3 = arith.constant 0 : index
    %c0_4 = arith.constant 0 : index
    %3 = vector.load %arg3[%c0_3, %c0_4] : memref<4x1xf32, #tpu.memory_space<vmem>>, vector<4x1xf32>
    %4 = vector.broadcast %3 : vector<4x1xf32> to vector<4x512xf32>
    %5 = arith.mulf %2, %4 : vector<4x512xf32>
    %c0_5 = arith.constant 0 : index
    %c0_6 = arith.constant 0 : index
    %6 = vector.load %arg4[%c0_5, %c0_6] : memref<4x1xf32, #tpu.memory_space<vmem>>, vector<4x1xf32>
    %7 = vector.broadcast %6 : vector<4x1xf32> to vector<4x512xf32>
    %8 = arith.addf %5, %7 : vector<4x512xf32>
    %c0_7 = arith.constant 0 : index
    %c0_8 = arith.constant 0 : index
    %9 = vector.load %arg5[%c0_7, %c0_8] : memref<4x512xf32, #tpu.memory_space<vmem>>, vector<4x512xf32>
    tpu.vector_store %arg5[%c0_7, %c0_8], %8 {strides = array<i32>} : memref<4x512xf32, #tpu.memory_space<vmem>>, vector<4x512xf32>,
    return
  }
  func.func @transform_0(%arg0: i32) -> (i32, i32) {
    %c0_i32 = arith.constant 0 : i32
    %c0_i32_0 = arith.constant 0 : i32
    %c0_i32_1 = arith.constant 0 : i32
    return %c0_i32, %c0_i32_0 : i32, i32
  }
  func.func @transform_1(%arg0: i32) -> (i32, i32) {
    %c0_i32 = arith.constant 0 : i32
    %c0_i32_0 = arith.constant 0 : i32
    return %c0_i32, %arg0 : i32, i32
  }
  func.func @transform_2(%arg0: i32) -> (i32, i32) {
    %c0_i32 = arith.constant 0 : i32
    %c0_i32_0 = arith.constant 0 : i32
    %c0_i32_1 = arith.constant 0 : i32
    return %c0_i32, %c0_i32_0 : i32, i32
  }
  func.func @transform_3(%arg0: i32) -> (i32, i32) {
    %c0_i32 = arith.constant 0 : i32
    %c0_i32_0 = arith.constant 0 : i32
    %c0_i32_1 = arith.constant 0 : i32
    return %c0_i32, %c0_i32_0 : i32, i32
  }
  func.func @transform_4(%arg0: i32) -> (i32, i32) {
    %c0_i32 = arith.constant 0 : i32
    %c0_i32_0 = arith.constant 0 : i32
    return %c0_i32, %arg0 : i32, i32
  }
}

module attributes {stable_mosaic.version = 11 : i64} {
  func.func @_fused_matmul_kernel(%arg0: i32, %arg1: memref<8x112xf32, #tpu.memory_space<vmem>>, %arg2: memref<112x512xf32, #tpu.memory_space<vmem>>, %arg3: memref<8x1xf32, #tpu.memory_space<vmem>>, %arg4: memref<8x1xf32, #tpu.memory_space<vmem>>, %arg5: memref<8x512xf32, #tpu.memory_space<vmem>>) attributes {dimension_semantics = [#tpu.dimension_semantics<parallel>], iteration_bounds = array<i64: 2>, scalar_prefetch = 0 : i64, scratch_operands = 0 : i64, tpu.core_type = #tpu.core_type<tc>, window_params = [{pipeline_mode = #tpu.pipeline_mode<synchronous>, transform_indices = @transform_0, window_bounds = array<i64: 8, 112>}, {transform_indices = @transform_1, window_bounds = array<i64: 112, 512>}, {pipeline_mode = #tpu.pipeline_mode<synchronous>, transform_indices = @transform_2, window_bounds = array<i64: 8, 1>}, {pipeline_mode = #tpu.pipeline_mode<synchronous>, transform_indices = @transform_3, window_bounds = array<i64: 8, 1>}, {transform_indices = @transform_4, window_bounds = array<i64: 8, 512>}]} {
    %c0 = arith.constant 0 : index
    %c0_0 = arith.constant 0 : index
    %0 = vector.load %arg1[%c0, %c0_0] : memref<8x112xf32, #tpu.memory_space<vmem>>, vector<8x112xf32>
    %c0_1 = arith.constant 0 : index
    %c0_2 = arith.constant 0 : index
    %1 = vector.load %arg2[%c0_1, %c0_2] : memref<112x512xf32, #tpu.memory_space<vmem>>, vector<112x512xf32>
    %cst = arith.constant dense<0.000000e+00> : vector<8x512xf32>
    %2 = tpu.matmul %0, %1, %cst {dimension_numbers = #tpu.dot_dimension_numbers<[1], [0], [0], [1], [0, 0, 1, 1], [], []>} : vector<8x112xf32>, vector<112x512xf32>, vector<8x512xf32> -> vector<8x512xf32>
    %c0_3 = arith.constant 0 : index
    %c0_4 = arith.constant 0 : index
    %3 = vector.load %arg3[%c0_3, %c0_4] : memref<8x1xf32, #tpu.memory_space<vmem>>, vector<8x1xf32>
    %4 = vector.broadcast %3 : vector<8x1xf32> to vector<8x512xf32>
    %5 = arith.mulf %2, %4 : vector<8x512xf32>
    %c0_5 = arith.constant 0 : index
    %c0_6 = arith.constant 0 : index
    %6 = vector.load %arg4[%c0_5, %c0_6] : memref<8x1xf32, #tpu.memory_space<vmem>>, vector<8x1xf32>
    %7 = vector.broadcast %6 : vector<8x1xf32> to vector<8x512xf32>
    %8 = arith.addf %5, %7 : vector<8x512xf32>
    %cst_7 = arith.constant 0.000000e+00 : f32
    %9 = vector.broadcast %cst_7 : f32 to vector<8x512xf32>
    %10 = arith.maximumf %8, %9 : vector<8x512xf32>
    %c0_8 = arith.constant 0 : index
    %c0_9 = arith.constant 0 : index
    %11 = vector.load %arg5[%c0_8, %c0_9] : memref<8x512xf32, #tpu.memory_space<vmem>>, vector<8x512xf32>
    tpu.vector_store %arg5[%c0_8, %c0_9], %10 {strides = array<i32>} : memref<8x512xf32, #tpu.memory_space<vmem>>, vector<8x512xf32>,
    return
  }
  func.func @transform_0(%arg0: i32) -> (i32, i32) {
    %c0_i32 = arith.constant 0 : i32
    %c0_i32_0 = arith.constant 0 : i32
    %c0_i32_1 = arith.constant 0 : i32
    return %c0_i32, %c0_i32_0 : i32, i32
  }
  func.func @transform_1(%arg0: i32) -> (i32, i32) {
    %c0_i32 = arith.constant 0 : i32
    %c0_i32_0 = arith.constant 0 : i32
    return %c0_i32, %arg0 : i32, i32
  }
  func.func @transform_2(%arg0: i32) -> (i32, i32) {
    %c0_i32 = arith.constant 0 : i32
    %c0_i32_0 = arith.constant 0 : i32
    %c0_i32_1 = arith.constant 0 : i32
    return %c0_i32, %c0_i32_0 : i32, i32
  }
  func.func @transform_3(%arg0: i32) -> (i32, i32) {
    %c0_i32 = arith.constant 0 : i32
    %c0_i32_0 = arith.constant 0 : i32
    %c0_i32_1 = arith.constant 0 : i32
    return %c0_i32, %c0_i32_0 : i32, i32
  }
  func.func @transform_4(%arg0: i32) -> (i32, i32) {
    %c0_i32 = arith.constant 0 : i32
    %c0_i32_0 = arith.constant 0 : i32
    return %c0_i32, %arg0 : i32, i32
  }
}

module attributes {stable_mosaic.version = 11 : i64} {
  func.func @_fused_matmul_kernel(%arg0: i32, %arg1: memref<8x216xf32, #tpu.memory_space<vmem>>, %arg2: memref<216x512xf32, #tpu.memory_space<vmem>>, %arg3: memref<8x1xf32, #tpu.memory_space<vmem>>, %arg4: memref<8x1xf32, #tpu.memory_space<vmem>>, %arg5: memref<8x512xf32, #tpu.memory_space<vmem>>) attributes {dimension_semantics = [#tpu.dimension_semantics<parallel>], iteration_bounds = array<i64: 2>, scalar_prefetch = 0 : i64, scratch_operands = 0 : i64, tpu.core_type = #tpu.core_type<tc>, window_params = [{pipeline_mode = #tpu.pipeline_mode<synchronous>, transform_indices = @transform_0, window_bounds = array<i64: 8, 216>}, {transform_indices = @transform_1, window_bounds = array<i64: 216, 512>}, {pipeline_mode = #tpu.pipeline_mode<synchronous>, transform_indices = @transform_2, window_bounds = array<i64: 8, 1>}, {pipeline_mode = #tpu.pipeline_mode<synchronous>, transform_indices = @transform_3, window_bounds = array<i64: 8, 1>}, {transform_indices = @transform_4, window_bounds = array<i64: 8, 512>}]} {
    %c0 = arith.constant 0 : index
    %c0_0 = arith.constant 0 : index
    %0 = vector.load %arg1[%c0, %c0_0] : memref<8x216xf32, #tpu.memory_space<vmem>>, vector<8x216xf32>
    %c0_1 = arith.constant 0 : index
    %c0_2 = arith.constant 0 : index
    %1 = vector.load %arg2[%c0_1, %c0_2] : memref<216x512xf32, #tpu.memory_space<vmem>>, vector<216x512xf32>
    %cst = arith.constant dense<0.000000e+00> : vector<8x512xf32>
    %2 = tpu.matmul %0, %1, %cst {dimension_numbers = #tpu.dot_dimension_numbers<[1], [0], [0], [1], [0, 0, 1, 1], [], []>} : vector<8x216xf32>, vector<216x512xf32>, vector<8x512xf32> -> vector<8x512xf32>
    %c0_3 = arith.constant 0 : index
    %c0_4 = arith.constant 0 : index
    %3 = vector.load %arg3[%c0_3, %c0_4] : memref<8x1xf32, #tpu.memory_space<vmem>>, vector<8x1xf32>
    %4 = vector.broadcast %3 : vector<8x1xf32> to vector<8x512xf32>
    %5 = arith.mulf %2, %4 : vector<8x512xf32>
    %c0_5 = arith.constant 0 : index
    %c0_6 = arith.constant 0 : index
    %6 = vector.load %arg4[%c0_5, %c0_6] : memref<8x1xf32, #tpu.memory_space<vmem>>, vector<8x1xf32>
    %7 = vector.broadcast %6 : vector<8x1xf32> to vector<8x512xf32>
    %8 = arith.addf %5, %7 : vector<8x512xf32>
    %cst_7 = arith.constant 0.000000e+00 : f32
    %9 = vector.broadcast %cst_7 : f32 to vector<8x512xf32>
    %10 = arith.maximumf %8, %9 : vector<8x512xf32>
    %c0_8 = arith.constant 0 : index
    %c0_9 = arith.constant 0 : index
    %11 = vector.load %arg5[%c0_8, %c0_9] : memref<8x512xf32, #tpu.memory_space<vmem>>, vector<8x512xf32>
    tpu.vector_store %arg5[%c0_8, %c0_9], %10 {strides = array<i32>} : memref<8x512xf32, #tpu.memory_space<vmem>>, vector<8x512xf32>,
    return
  }
  func.func @transform_0(%arg0: i32) -> (i32, i32) {
    %c0_i32 = arith.constant 0 : i32
    %c0_i32_0 = arith.constant 0 : i32
    %c0_i32_1 = arith.constant 0 : i32
    return %c0_i32, %c0_i32_0 : i32, i32
  }
  func.func @transform_1(%arg0: i32) -> (i32, i32) {
    %c0_i32 = arith.constant 0 : i32
    %c0_i32_0 = arith.constant 0 : i32
    return %c0_i32, %arg0 : i32, i32
  }
  func.func @transform_2(%arg0: i32) -> (i32, i32) {
    %c0_i32 = arith.constant 0 : i32
    %c0_i32_0 = arith.constant 0 : i32
    %c0_i32_1 = arith.constant 0 : i32
    return %c0_i32, %c0_i32_0 : i32, i32
  }
  func.func @transform_3(%arg0: i32) -> (i32, i32) {
    %c0_i32 = arith.constant 0 : i32
    %c0_i32_0 = arith.constant 0 : i32
    %c0_i32_1 = arith.constant 0 : i32
    return %c0_i32, %c0_i32_0 : i32, i32
  }
  func.func @transform_4(%arg0: i32) -> (i32, i32) {
    %c0_i32 = arith.constant 0 : i32
    %c0_i32_0 = arith.constant 0 : i32
    return %c0_i32, %arg0 : i32, i32
  }
}

</mosaic_0001>

<bundles_post_ra>
// kernel: downsampling_block_forward.3
= control target key start
LH: loop header
LB: loop body
LE: loop exit
PB: predicated region body
PF: predicated region fallthrough
CT: control target
= control target key end

     0   :  { %s599_s15 = smov 0   ;;  %s601_s16 = smov 0   ;;  %s678_s0 = inlined_call_operand.vmem [shape: f32[4,32], index: 0, kind: input, shape index: {}]   ;;  %s679_s1 = inlined_call_operand.vmem [shape: f32[32,1024], index: 1, kind: input, shape index: {}]   ;;  %s680_s2 = inlined_call_operand.vmem [shape: f32[4,1], index: 2, kind: input, shape index: {}]   ;;  %s681_s3 = inlined_call_operand.vmem [shape: f32[4,1], index: 3, kind: input, shape index: {}]   ;;  %s682_s4 = inlined_call_operand.vmem [shape: f32[4,1024], index: 4, kind: output, shape index: {}]  }
   0x1   :  { %s603_s17 = smov 0  }
   0x2 LB: > { %s505_s18 = sadd.s32 4294967295, %s570_s17   ;;  %s616_s19 = sadd.s32 1, %s570_s17   ;;  %s570_s17 = sphi %s603_s17, %s685_s17   ;;  %s566_s16 = sphi %s601_s16, %s684_s16   ;;  %s562_s15 = sphi %s599_s15, %s683_s15  }
   0x3   : > { %s39_s20 = ssub.s32 %s570_s17, %s616_s19  ;;  %s42_s21 = sadd.s32 1, %s566_s16 }
   0x4   : > { %p40_p0 = scmp.eq.s32.totalorder %s39_s20, 0  ;;  %p49_p1 = scmp.ne.s32.totalorder %s566_s16, %s562_s15 }
   0x5   : > { %p50_p2 = scmp.eq.s32.totalorder %s570_s17, 0  ;;  %p508_p4 = scmp.ge.s32.totalorder %s570_s17, 2 }
   0x6   : > { %s625_s22 = scalar_select %p40_p0, %s566_s16, %s42_s21  }
   0x7   : > { %p51_p3 = por %p50_p2, %p49_p1  ;;  %152 = sbr.rel (%p508_p4) target bundleno = 24 (0x18), region = 28 }
   0xc   : > { %155 = sbr.rel (!%p51_p3) target bundleno = 24 (0x18), region = 32  ;;  %s157_s23 = sand.u32 (%p51_p3), 1, %s566_s16  }
   0xd   : > { %s520_s24 = sshll.u32 (%p51_p3), %s570_s17, 5  ;;  %s509_s25 = sshll.u32 (%p51_p3), %s157_s23, 7 }
   0xe   : > { %s633_s28 = scalar_lea.vmem (%p51_p3), %s679_s1, %s520_s24  ;;  %s159_s29 = scalar_lea.vmem (%p51_p3), [#allocation2], %s509_s25 }
   0xf   : > { %v175_v0 = vld [vmem:[%s633_s28] sm:$0xff] (%p51_p3)  ;;  %v177_v1 = vld [vmem:[%s633_s28 + $0x8] sm:$0xff] (%p51_p3)  ;;  %v179_v2 = vld [vmem:[%s633_s28 + $0x10] sm:$0xff] (%p51_p3) }
  0x10   : > { %176 = vst [vmem:[%s159_s29] sm:$0xff] (%p51_p3), %v175_v0  ;;  %178 = vst [vmem:[%s159_s29 + $0x8] sm:$0xff] (%p51_p3), %v177_v1  ;;  %v181_v3 = vld [vmem:[%s633_s28 + $0x18] sm:$0xff] (%p51_p3)  ;;  %v183_v4 = vld [vmem:[%s633_s28 + $0x40] sm:$0xff] (%p51_p3) }
  0x11   : > { %180 = vst [vmem:[%s159_s29 + $0x10] sm:$0xff] %v179_v2  ;;  %v185_v5 = vld [vmem:[%s633_s28 + $0x48] sm:$0xff]  ;;  %182 = vst [vmem:[%s159_s29 + $0x18] sm:$0xff] %v181_v3  ;;  %v187_v6 = vld [vmem:[%s633_s28 + $0x50] sm:$0xff] }
  0x12   : > { %184 = vst [vmem:[%s159_s29 + $0x20] sm:$0xff] %v183_v4  ;;  %186 = vst [vmem:[%s159_s29 + $0x28] sm:$0xff] %v185_v5  ;;  %v189_v7 = vld [vmem:[%s633_s28 + $0x58] sm:$0xff]  ;;  %v191_v8 = vld [vmem:[%s633_s28 + $0x80] sm:$0xff] }
  0x13   : > { %188 = vst [vmem:[%s159_s29 + $0x30] sm:$0xff] %v187_v6  ;;  %190 = vst [vmem:[%s159_s29 + $0x38] sm:$0xff] %v189_v7  ;;  %v193_v9 = vld [vmem:[%s633_s28 + $0x88] sm:$0xff]  ;;  %v195_v10 = vld [vmem:[%s633_s28 + $0x90] sm:$0xff] }
  0x14   : > { %192 = vst [vmem:[%s159_s29 + $0x40] sm:$0xff] %v191_v8  ;;  %v197_v11 = vld [vmem:[%s633_s28 + $0x98] sm:$0xff]  ;;  %194 = vst [vmem:[%s159_s29 + $0x48] sm:$0xff] %v193_v9  ;;  %v199_v12 = vld [vmem:[%s633_s28 + $0xc0] sm:$0xff] }
  0x15   : > { %196 = vst [vmem:[%s159_s29 + $0x50] sm:$0xff] %v195_v10  ;;  %198 = vst [vmem:[%s159_s29 + $0x58] sm:$0xff] %v197_v11  ;;  %v201_v13 = vld [vmem:[%s633_s28 + $0xc8] sm:$0xff]  ;;  %v203_v14 = vld [vmem:[%s633_s28 + $0xd0] sm:$0xff] }
  0x16   : > { %200 = vst [vmem:[%s159_s29 + $0x60] sm:$0xff] %v199_v12  ;;  %202 = vst [vmem:[%s159_s29 + $0x68] sm:$0xff] %v201_v13  ;;  %v205_v15 = vld [vmem:[%s633_s28 + $0xd8] sm:$0xff] }
  0x17   : > { %204 = vst [vmem:[%s159_s29 + $0x70] sm:$0xff] %v203_v14  ;;  %206 = vst [vmem:[%s159_s29 + $0x78] sm:$0xff] %v205_v15 }
  0x18 PF: > { %p512_p5 = scmp.ge.s32.totalorder %s570_s17, 1  ;;  %p211_p6 = scmp.lt.s32.totalorder %s570_s17, 3 }
  0x1a   : > { %p212_p7 = pnand %p512_p5, %p211_p6 }
  0x1b   : > { %s218_s30 = sand.u32 (!%p212_p7), 1, %s562_s15   ;;  %s514_s13 = sshll.u32 (!%p212_p7), %s505_s18, 2 }
  0x1c   : > { %215 = sbr.rel (%p212_p7) target bundleno = 246 (0xf6), region = 55  ;;  %s513_s5 = sshll.u32 (!%p212_p7), %s218_s30, 7 }
  0x1d   : > { %s220_s8 = scalar_lea.vmem (!%p212_p7), [#allocation2], %s513_s5  ;;  %p245_p8 = scmp.lt.s32.totalorder (!%p212_p7), %s514_s13, 7 }
  0x21   : > { %v572_v16 = vmov 0.0   ;;  %v413_v17 = vld [vmem:[%s680_s2] sm:$0xf]  ;;  %v573_v18 = vmov 0   ;;  %v264_v19 = vld [vmem:[%s220_s8 + $0x68] sm:$0xff]  ;;  %v266_v20 = vld [vmem:[%s220_s8 + $0x78] sm:$0xff] }
  0x22   : > { %335 = vmatprep.mubr.f32.mxu0 %v572_v16  ;;  %406 = vmatprep.mubr.f32.mxu1 %v572_v16  ;;  %v263_v21 = vld [vmem:[%s220_s8 + $0x60] sm:$0xff]  ;;  %v265_v22 = vld [vmem:[%s220_s8 + $0x70] sm:$0xff]  ;;  %v260_v23 = vld [vmem:[%s220_s8 + $0x48] sm:$0xff]  ;;  %vm267_vm0 = vcmask 261120   ;;  %s687_s13 = smov (!%p245_p8, %s514_s13), 7 }
  0x23   : > { %547 = vset.pattern.permute.xlu0 %v573_v18  ;;  %295 = vmatprep.subr.mxu0 %v264_v19  ;;  %v262_v24 = vld [vmem:[%s220_s8 + $0x58] sm:$0xff]  ;;  %v259_v25 = vld [vmem:[%s220_s8 + $0x40] sm:$0xff]  ;;  %v261_v26 = vld [vmem:[%s220_s8 + $0x50] sm:$0xff]  ;;  %s515_s14 = sshll.u32 %s687_s13, 2 }
  0x24   : > { %416 = vperm.xlu0 %547, %v413_v17   ;;  %366 = vmatprep.subr.mxu1 %v266_v20  ;;  %v256_v27 = vld [vmem:[%s220_s8 + $0x28] sm:$0xff]  ;;  %v258_v28 = vld [vmem:[%s220_s8 + $0x38] sm:$0xff]  ;;  %v255_v29 = vld [vmem:[%s220_s8 + $0x20] sm:$0xff]  ;;  %s248_s18 = scalar_lea.vmem %s682_s4, %s515_s14 }
  0x25   : > { %296 = vmatpush1.msra.mxu0 %v263_v21  ;;  %367 = vmatpush1.msra.mxu1 %v265_v22  ;;  %v257_v30 = vld [vmem:[%s220_s8 + $0x30] sm:$0xff]  ;;  %v252_v31 = vld [vmem:[%s220_s8 + $0x8] sm:$0xff]  ;;  %v254_v32 = vld [vmem:[%s220_s8 + $0x18] sm:$0xff] }
  0x26   : > { %297 = vmatprep.subr.mxu0 %v260_v23  ;;  %368 = vmatprep.subr.mxu1 %v262_v24  ;;  %v251_v33 = vld [vmem:[%s220_s8] sm:$0xff]  ;;  %v253_v34 = vld [vmem:[%s220_s8 + $0x10] sm:$0xff] }
  0x27   : > { %298 = vmatpush1.msra.mxu0 %v259_v25  ;;  %369 = vmatpush1.msra.mxu1 %v261_v26  ;;  %v250_v35 = vld [vmem:[%s678_s0] sm:$0xf] }
  0x28   : > { %299 = vmatprep.subr.mxu0 %v256_v27  ;;  %370 = vmatprep.subr.mxu1 %v258_v28  ;;  %v423_v36 = vld [vmem:[%s681_s3] sm:$0xf] }
  0x29   : > { %300 = vmatpush1.msra.mxu0 %v255_v29  ;;  %371 = vmatpush1.msra.mxu1 %v257_v30 }
  0x2a   : > { %301 = vmatprep.subr.mxu0 %v252_v31  ;;  %372 = vmatprep.subr.mxu1 %v254_v32 }
  0x2b   : > { %302 = vmatpush1.msra.mxu0 %v251_v33  ;;  %373 = vmatpush1.msra.mxu1 %v253_v34 }
  0x2c   : > { %516 = vmatmul.mubr.msk.f32.vlgmr.msra.gmra.mxu0 %vm267_vm0, %v250_v35  ;;  %517 = vmatmul.mubr.msk.f32.vlgmr.msra.gmra.mxu1 %vm267_vm0, %v250_v35 }
  0x2d   : > { %426 = vperm.xlu0 %547, %v423_v36  }
  0x9f   : > { %v417_v37 = vpop.permute.xlu0 %416 }
  0xa8   : > { %v427_v46 = vpop.permute.xlu0 %426 }
  0xec   : > { %v337_v38 = vpop.f32.mrf.mxu0  ;;  %v408_v39 = vpop.f32.mrf.mxu1 }
  0xed   : > { %v419_v40 = vmul.f32 %v417_v37, %v337_v38  ;;  %v421_v41 = vmul.f32 %v417_v37, %v408_v39 }
  0xee   : > { %v339_v42 = vpop.f32.mrf.mxu0  ;;  %v410_v43 = vpop.f32.mrf.mxu1 }
  0xef   : > { %v420_v44 = vmul.f32 %v417_v37, %v339_v42  ;;  %v422_v45 = vmul.f32 %v417_v37, %v410_v43  ;;  %v429_v47 = vadd.f32 %v427_v46, %v419_v40  ;;  %v431_v48 = vadd.f32 %v427_v46, %v421_v41 }
  0xf1   : > { %v430_v49 = vadd.f32 %v427_v46, %v420_v44  ;;  %v432_v50 = vadd.f32 %v427_v46, %v422_v45 }
  0xf3   : > { %v437_v51 = vcombine.low %v429_v47, %v430_v49  ;;  %v438_v52 = vcombine.low %v431_v48, %v432_v50 }
  0xf5   : > { %441 = vst [vmem:[%s248_s18] sm:$0xff] %v437_v51  ;;  %442 = vst [vmem:[%s248_s18 + $0x8] sm:$0xff] %v438_v52 }
  0xf6 PF: > { %p11_p9 = scmp.ge.s32.totalorder %s616_s19, 4   ;;  %s683_s15 = smov %s566_s16 }
  0xf7   : > { %s684_s16 = smov %s625_s22  ;;  %s685_s17 = smov %s616_s19 }
  0xf8   :  { %13 = sbr.rel (!%p11_p9) target bundleno = 2 (0x2), region = 94 }

// kernel: downsampling_block_forward.4
= control target key start
LH: loop header
LB: loop body
LE: loop exit
PB: predicated region body
PF: predicated region fallthrough
CT: control target
= control target key end

     0   :  { %s717_s15 = smov 0   ;;  %s719_s16 = smov 0   ;;  %s952_s0 = inlined_call_operand.vmem [shape: f32[8,112], index: 0, kind: input, shape index: {}]   ;;  %s953_s1 = inlined_call_operand.vmem [shape: f32[112,1024], index: 1, kind: input, shape index: {}]   ;;  %s954_s2 = inlined_call_operand.vmem [shape: f32[8,1], index: 2, kind: input, shape index: {}]   ;;  %s955_s3 = inlined_call_operand.vmem [shape: f32[8,1], index: 3, kind: input, shape index: {}]   ;;  %s956_s4 = inlined_call_operand.vmem [shape: f32[8,1024], index: 4, kind: output, shape index: {}]  }
   0x1   :  { %s721_s17 = smov 0  }
   0x2 LB: > { %s623_s18 = sadd.s32 4294967295, %s688_s17   ;;  %s734_s19 = sadd.s32 1, %s688_s17   ;;  %s688_s17 = sphi %s721_s17, %s959_s17   ;;  %s684_s16 = sphi %s719_s16, %s958_s16   ;;  %s680_s15 = sphi %s717_s15, %s957_s15  }
   0x3   : > { %s39_s20 = ssub.s32 %s688_s17, %s734_s19  ;;  %s42_s21 = sadd.s32 1, %s684_s16 }
   0x4   : > { %p40_p0 = scmp.eq.s32.totalorder %s39_s20, 0  ;;  %p49_p1 = scmp.ne.s32.totalorder %s684_s16, %s680_s15 }
   0x5   : > { %p50_p2 = scmp.eq.s32.totalorder %s688_s17, 0  ;;  %p626_p4 = scmp.ge.s32.totalorder %s688_s17, 2 }
   0x6   : > { %s743_s22 = scalar_select %p40_p0, %s684_s16, %s42_s21  }
   0x7   : > { %p51_p3 = por %p50_p2, %p49_p1  ;;  %152 = sbr.rel (%p626_p4) target bundleno = 45 (0x2d), region = 28 }
   0xc   : > { %155 = sbr.rel (!%p51_p3) target bundleno = 45 (0x2d), region = 32  ;;  %s157_s23 = sand.u32 (%p51_p3), 1, %s684_s16  }
   0xd   : > { %s636_s24 = sshll.u32 (%p51_p3), %s688_s17, 5  ;;  %s637_s25 = smul.u32 (%p51_p3), 448, %s157_s23 }
   0xe   : > { %s751_s28 = scalar_lea.vmem (%p51_p3), %s953_s1, %s636_s24 }
   0xf   : > { %v175_v0 = vld [vmem:[%s751_s28] sm:$0xff] (%p51_p3)  ;;  %v177_v1 = vld [vmem:[%s751_s28 + $0x8] sm:$0xff] (%p51_p3)  ;;  %v179_v2 = vld [vmem:[%s751_s28 + $0x10] sm:$0xff] (%p51_p3)  ;;  %s759_s29 = scalar_lea.vmem (%p51_p3), [#allocation2], %s637_s25 }
  0x10   : > { %v181_v3 = vld [vmem:[%s751_s28 + $0x18] sm:$0xff] (%p51_p3)  ;;  %v183_v4 = vld [vmem:[%s751_s28 + $0x40] sm:$0xff] (%p51_p3)  ;;  %v185_v5 = vld [vmem:[%s751_s28 + $0x48] sm:$0xff] (%p51_p3)  ;;  %176 = vst [vmem:[%s759_s29] sm:$0xff] (%p51_p3), %v175_v0 }
  0x11   : > { %178 = vst [vmem:[%s759_s29 + $0x8] sm:$0xff] %v177_v1  ;;  %180 = vst [vmem:[%s759_s29 + $0x10] sm:$0xff] %v179_v2  ;;  %v187_v6 = vld [vmem:[%s751_s28 + $0x50] sm:$0xff]  ;;  %v189_v7 = vld [vmem:[%s751_s28 + $0x58] sm:$0xff] }
  0x12   : > { %182 = vst [vmem:[%s759_s29 + $0x18] sm:$0xff] %v181_v3  ;;  %184 = vst [vmem:[%s759_s29 + $0x20] sm:$0xff] %v183_v4  ;;  %v191_v8 = vld [vmem:[%s751_s28 + $0x80] sm:$0xff]  ;;  %v193_v9 = vld [vmem:[%s751_s28 + $0x88] sm:$0xff] }
  0x13   : > { %186 = vst [vmem:[%s759_s29 + $0x28] sm:$0xff] %v185_v5  ;;  %188 = vst [vmem:[%s759_s29 + $0x30] sm:$0xff] %v187_v6  ;;  %v195_v10 = vld [vmem:[%s751_s28 + $0x90] sm:$0xff]  ;;  %v197_v11 = vld [vmem:[%s751_s28 + $0x98] sm:$0xff] }
  0x14   : > { %190 = vst [vmem:[%s759_s29 + $0x38] sm:$0xff] %v189_v7  ;;  %192 = vst [vmem:[%s759_s29 + $0x40] sm:$0xff] %v191_v8  ;;  %v199_v12 = vld [vmem:[%s751_s28 + $0xc0] sm:$0xff]  ;;  %v201_v13 = vld [vmem:[%s751_s28 + $0xc8] sm:$0xff] }
  0x15   : > { %194 = vst [vmem:[%s759_s29 + $0x48] sm:$0xff] %v193_v9  ;;  %196 = vst [vmem:[%s759_s29 + $0x50] sm:$0xff] %v195_v10  ;;  %v203_v14 = vld [vmem:[%s751_s28 + $0xd0] sm:$0xff]  ;;  %v205_v15 = vld [vmem:[%s751_s28 + $0xd8] sm:$0xff] }
  0x16   : > { %198 = vst [vmem:[%s759_s29 + $0x58] sm:$0xff] %v197_v11  ;;  %200 = vst [vmem:[%s759_s29 + $0x60] sm:$0xff] %v199_v12  ;;  %v207_v16 = vld [vmem:[%s751_s28 + $0x100] sm:$0xff]  ;;  %v209_v17 = vld [vmem:[%s751_s28 + $0x108] sm:$0xff] }
  0x17   : > { %202 = vst [vmem:[%s759_s29 + $0x68] sm:$0xff] %v201_v13  ;;  %204 = vst [vmem:[%s759_s29 + $0x70] sm:$0xff] %v203_v14  ;;  %v211_v18 = vld [vmem:[%s751_s28 + $0x110] sm:$0xff]  ;;  %v213_v19 = vld [vmem:[%s751_s28 + $0x118] sm:$0xff] }
  0x18   : > { %206 = vst [vmem:[%s759_s29 + $0x78] sm:$0xff] %v205_v15  ;;  %208 = vst [vmem:[%s759_s29 + $0x80] sm:$0xff] %v207_v16  ;;  %v215_v20 = vld [vmem:[%s751_s28 + $0x140] sm:$0xff]  ;;  %v217_v21 = vld [vmem:[%s751_s28 + $0x148] sm:$0xff] }
  0x19   : > { %210 = vst [vmem:[%s759_s29 + $0x88] sm:$0xff] %v209_v17  ;;  %212 = vst [vmem:[%s759_s29 + $0x90] sm:$0xff] %v211_v18  ;;  %v219_v22 = vld [vmem:[%s751_s28 + $0x150] sm:$0xff]  ;;  %v221_v23 = vld [vmem:[%s751_s28 + $0x158] sm:$0xff] }
  0x1a   : > { %214 = vst [vmem:[%s759_s29 + $0x98] sm:$0xff] %v213_v19  ;;  %216 = vst [vmem:[%s759_s29 + $0xa0] sm:$0xff] %v215_v20  ;;  %v223_v24 = vld [vmem:[%s751_s28 + $0x180] sm:$0xff]  ;;  %v225_v25 = vld [vmem:[%s751_s28 + $0x188] sm:$0xff] }
  0x1b   : > { %218 = vst [vmem:[%s759_s29 + $0xa8] sm:$0xff] %v217_v21  ;;  %220 = vst [vmem:[%s759_s29 + $0xb0] sm:$0xff] %v219_v22  ;;  %v227_v26 = vld [vmem:[%s751_s28 + $0x190] sm:$0xff]  ;;  %v229_v27 = vld [vmem:[%s751_s28 + $0x198] sm:$0xff] }
  0x1c   : > { %222 = vst [vmem:[%s759_s29 + $0xb8] sm:$0xff] %v221_v23  ;;  %224 = vst [vmem:[%s759_s29 + $0xc0] sm:$0xff] %v223_v24  ;;  %v231_v28 = vld [vmem:[%s751_s28 + $0x1c0] sm:$0xff]  ;;  %v233_v29 = vld [vmem:[%s751_s28 + $0x1c8] sm:$0xff] }
  0x1d   : > { %226 = vst [vmem:[%s759_s29 + $0xc8] sm:$0xff] %v225_v25  ;;  %228 = vst [vmem:[%s759_s29 + $0xd0] sm:$0xff] %v227_v26  ;;  %v235_v30 = vld [vmem:[%s751_s28 + $0x1d0] sm:$0xff]  ;;  %v237_v31 = vld [vmem:[%s751_s28 + $0x1d8] sm:$0xff] }
  0x1e   : > { %230 = vst [vmem:[%s759_s29 + $0xd8] sm:$0xff] %v229_v27  ;;  %232 = vst [vmem:[%s759_s29 + $0xe0] sm:$0xff] %v231_v28  ;;  %v239_v32 = vld [vmem:[%s751_s28 + $0x200] sm:$0xff]  ;;  %v241_v33 = vld [vmem:[%s751_s28 + $0x208] sm:$0xff] }
  0x1f   : > { %234 = vst [vmem:[%s759_s29 + $0xe8] sm:$0xff] %v233_v29  ;;  %236 = vst [vmem:[%s759_s29 + $0xf0] sm:$0xff] %v235_v30  ;;  %v243_v34 = vld [vmem:[%s751_s28 + $0x210] sm:$0xff]  ;;  %v245_v35 = vld [vmem:[%s751_s28 + $0x218] sm:$0xff] }
  0x20   : > { %238 = vst [vmem:[%s759_s29 + $0xf8] sm:$0xff] %v237_v31  ;;  %240 = vst [vmem:[%s759_s29 + $0x100] sm:$0xff] %v239_v32  ;;  %v247_v36 = vld [vmem:[%s751_s28 + $0x240] sm:$0xff]  ;;  %v249_v37 = vld [vmem:[%s751_s28 + $0x248] sm:$0xff] }
  0x21   : > { %242 = vst [vmem:[%s759_s29 + $0x108] sm:$0xff] %v241_v33  ;;  %244 = vst [vmem:[%s759_s29 + $0x110] sm:$0xff] %v243_v34  ;;  %v251_v38 = vld [vmem:[%s751_s28 + $0x250] sm:$0xff]  ;;  %v253_v39 = vld [vmem:[%s751_s28 + $0x258] sm:$0xff] }
  0x22   : > { %246 = vst [vmem:[%s759_s29 + $0x118] sm:$0xff] %v245_v35  ;;  %248 = vst [vmem:[%s759_s29 + $0x120] sm:$0xff] %v247_v36  ;;  %v255_v40 = vld [vmem:[%s751_s28 + $0x280] sm:$0xff]  ;;  %v257_v41 = vld [vmem:[%s751_s28 + $0x288] sm:$0xff] }
  0x23   : > { %250 = vst [vmem:[%s759_s29 + $0x128] sm:$0xff] %v249_v37  ;;  %252 = vst [vmem:[%s759_s29 + $0x130] sm:$0xff] %v251_v38  ;;  %v259_v42 = vld [vmem:[%s751_s28 + $0x290] sm:$0xff]  ;;  %v261_v43 = vld [vmem:[%s751_s28 + $0x298] sm:$0xff] }
  0x24   : > { %254 = vst [vmem:[%s759_s29 + $0x138] sm:$0xff] %v253_v39  ;;  %256 = vst [vmem:[%s759_s29 + $0x140] sm:$0xff] %v255_v40  ;;  %v263_v44 = vld [vmem:[%s751_s28 + $0x2c0] sm:$0xff]  ;;  %v265_v45 = vld [vmem:[%s751_s28 + $0x2c8] sm:$0xff] }
  0x25   : > { %258 = vst [vmem:[%s759_s29 + $0x148] sm:$0xff] %v257_v41  ;;  %260 = vst [vmem:[%s759_s29 + $0x150] sm:$0xff] %v259_v42  ;;  %v267_v46 = vld [vmem:[%s751_s28 + $0x2d0] sm:$0xff]  ;;  %v269_v47 = vld [vmem:[%s751_s28 + $0x2d8] sm:$0xff] }
  0x26   : > { %262 = vst [vmem:[%s759_s29 + $0x158] sm:$0xff] %v261_v43  ;;  %264 = vst [vmem:[%s759_s29 + $0x160] sm:$0xff] %v263_v44  ;;  %v271_v48 = vld [vmem:[%s751_s28 + $0x300] sm:$0xff]  ;;  %v273_v49 = vld [vmem:[%s751_s28 + $0x308] sm:$0xff] }
  0x27   : > { %266 = vst [vmem:[%s759_s29 + $0x168] sm:$0xff] %v265_v45  ;;  %268 = vst [vmem:[%s759_s29 + $0x170] sm:$0xff] %v267_v46  ;;  %v275_v50 = vld [vmem:[%s751_s28 + $0x310] sm:$0xff]  ;;  %v277_v51 = vld [vmem:[%s751_s28 + $0x318] sm:$0xff] }
  0x28   : > { %270 = vst [vmem:[%s759_s29 + $0x178] sm:$0xff] %v269_v47  ;;  %272 = vst [vmem:[%s759_s29 + $0x180] sm:$0xff] %v271_v48  ;;  %v279_v52 = vld [vmem:[%s751_s28 + $0x340] sm:$0xff]  ;;  %v281_v53 = vld [vmem:[%s751_s28 + $0x348] sm:$0xff] }
  0x29   : > { %274 = vst [vmem:[%s759_s29 + $0x188] sm:$0xff] %v273_v49  ;;  %276 = vst [vmem:[%s759_s29 + $0x190] sm:$0xff] %v275_v50  ;;  %v283_v54 = vld [vmem:[%s751_s28 + $0x350] sm:$0xff]  ;;  %v285_v55 = vld [vmem:[%s751_s28 + $0x358] sm:$0xff] }
  0x2a   : > { %278 = vst [vmem:[%s759_s29 + $0x198] sm:$0xff] %v277_v51  ;;  %280 = vst [vmem:[%s759_s29 + $0x1a0] sm:$0xff] %v279_v52 }
  0x2b   : > { %282 = vst [vmem:[%s759_s29 + $0x1a8] sm:$0xff] %v281_v53  ;;  %284 = vst [vmem:[%s759_s29 + $0x1b0] sm:$0xff] %v283_v54 }
  0x2c   : > { %286 = vst [vmem:[%s759_s29 + $0x1b8] sm:$0xff] %v285_v55 }
  0x2d PF: > { %p629_p5 = scmp.ge.s32.totalorder %s688_s17, 1  ;;  %p291_p6 = scmp.lt.s32.totalorder %s688_s17, 3 }
  0x2f   : > { %p292_p7 = pnand %p629_p5, %p291_p6 }
  0x30   : > { %s298_s30 = sand.u32 (!%p292_p7), 1, %s680_s15   ;;  %s630_s13 = sshll.u32 (!%p292_p7), %s623_s18, 2 }
  0x31   : > { %295 = sbr.rel (%p292_p7) target bundleno = 287 (0x11f), region = 55  ;;  %p325_p8 = scmp.lt.s32.totalorder (!%p292_p7), %s630_s13, 7 }
  0x32   : > { %s638_s7 = smul.u32 (!%p292_p7), 448, %s298_s30 }
  0x34   : > { %s873_s8 = scalar_lea.vmem (!%p292_p7), [#allocation2], %s638_s7 }
  0x36   : > { %v533_v56 = vld [vmem:[%s954_s2] sm:$0xff]  ;;  %v690_v57 = vmov 0.0   ;;  %v691_v58 = vmov 0   ;;  %v384_v59 = vld [vmem:[%s873_s8 + $0x1a8] sm:$0xff]  ;;  %v386_v60 = vld [vmem:[%s873_s8 + $0x1b8] sm:$0xff]  ;;  %vm387_vm0 = vcmask 916480  }
  0x37   : > { %455 = vmatprep.mubr.f32.mxu0 %v690_v57  ;;  %526 = vmatprep.mubr.f32.mxu1 %v690_v57  ;;  %v383_v61 = vld [vmem:[%s873_s8 + $0x1a0] sm:$0xff]  ;;  %v385_v62 = vld [vmem:[%s873_s8 + $0x1b0] sm:$0xff]  ;;  %v380_v63 = vld [vmem:[%s873_s8 + $0x188] sm:$0xff]  ;;  %s961_s13 = smov (!%p325_p8, %s630_s13), 7 }
  0x38   : > { %665 = vset.pattern.permute.xlu0 %v691_v58  ;;  %395 = vmatprep.subr.mxu0 %v384_v59  ;;  %v382_v0 = vld [vmem:[%s873_s8 + $0x198] sm:$0xff]  ;;  %v379_v1 = vld [vmem:[%s873_s8 + $0x180] sm:$0xff]  ;;  %v381_v2 = vld [vmem:[%s873_s8 + $0x190] sm:$0xff]  ;;  %s631_s14 = sshll.u32 %s961_s13, 3 }
  0x39   : > { %536 = vperm.xlu0 %665, %v533_v56   ;;  %466 = vmatprep.subr.mxu1 %v386_v60  ;;  %v376_v3 = vld [vmem:[%s873_s8 + $0x168] sm:$0xff]  ;;  %v378_v4 = vld [vmem:[%s873_s8 + $0x178] sm:$0xff]  ;;  %v375_v5 = vld [vmem:[%s873_s8 + $0x160] sm:$0xff]  ;;  %s328_s21 = scalar_lea.vmem %s956_s4, %s631_s14 }
  0x3a   : > { %396 = vmatpush1.msra.mxu0 %v383_v61  ;;  %467 = vmatpush1.msra.mxu1 %v385_v62  ;;  %v377_v6 = vld [vmem:[%s873_s8 + $0x170] sm:$0xff]  ;;  %v372_v7 = vld [vmem:[%s873_s8 + $0x148] sm:$0xff]  ;;  %v374_v8 = vld [vmem:[%s873_s8 + $0x158] sm:$0xff] }
  0x3b   : > { %397 = vmatprep.subr.mxu0 %v380_v63  ;;  %468 = vmatprep.subr.mxu1 %v382_v0  ;;  %v371_v9 = vld [vmem:[%s873_s8 + $0x140] sm:$0xff]  ;;  %v373_v10 = vld [vmem:[%s873_s8 + $0x150] sm:$0xff]  ;;  %v368_v11 = vld [vmem:[%s873_s8 + $0x128] sm:$0xff] }
  0x3c   : > { %398 = vmatpush1.msra.mxu0 %v379_v1  ;;  %469 = vmatpush1.msra.mxu1 %v381_v2  ;;  %v370_v12 = vld [vmem:[%s873_s8 + $0x138] sm:$0xff]  ;;  %v367_v13 = vld [vmem:[%s873_s8 + $0x120] sm:$0xff]  ;;  %v369_v14 = vld [vmem:[%s873_s8 + $0x130] sm:$0xff] }
  0x3d   : > { %399 = vmatprep.subr.mxu0 %v376_v3  ;;  %470 = vmatprep.subr.mxu1 %v378_v4  ;;  %v364_v15 = vld [vmem:[%s873_s8 + $0x108] sm:$0xff]  ;;  %v366_v16 = vld [vmem:[%s873_s8 + $0x118] sm:$0xff]  ;;  %v363_v17 = vld [vmem:[%s873_s8 + $0x100] sm:$0xff] }
  0x3e   : > { %400 = vmatpush1.msra.mxu0 %v375_v5  ;;  %471 = vmatpush1.msra.mxu1 %v377_v6  ;;  %v365_v18 = vld [vmem:[%s873_s8 + $0x110] sm:$0xff]  ;;  %v360_v19 = vld [vmem:[%s873_s8 + $0xe8] sm:$0xff]  ;;  %v362_v20 = vld [vmem:[%s873_s8 + $0xf8] sm:$0xff] }
  0x3f   : > { %401 = vmatprep.subr.mxu0 %v372_v7  ;;  %472 = vmatprep.subr.mxu1 %v374_v8  ;;  %v359_v21 = vld [vmem:[%s873_s8 + $0xe0] sm:$0xff]  ;;  %v361_v22 = vld [vmem:[%s873_s8 + $0xf0] sm:$0xff]  ;;  %v356_v23 = vld [vmem:[%s873_s8 + $0xc8] sm:$0xff] }
  0x40   : > { %402 = vmatpush1.msra.mxu0 %v371_v9  ;;  %473 = vmatpush1.msra.mxu1 %v373_v10  ;;  %v358_v24 = vld [vmem:[%s873_s8 + $0xd8] sm:$0xff]  ;;  %v355_v25 = vld [vmem:[%s873_s8 + $0xc0] sm:$0xff]  ;;  %v357_v26 = vld [vmem:[%s873_s8 + $0xd0] sm:$0xff] }
  0x41   : > { %403 = vmatprep.subr.mxu0 %v368_v11  ;;  %474 = vmatprep.subr.mxu1 %v370_v12  ;;  %v352_v27 = vld [vmem:[%s873_s8 + $0xa8] sm:$0xff]  ;;  %v354_v28 = vld [vmem:[%s873_s8 + $0xb8] sm:$0xff]  ;;  %v351_v29 = vld [vmem:[%s873_s8 + $0xa0] sm:$0xff] }
  0x42   : > { %404 = vmatpush1.msra.mxu0 %v367_v13  ;;  %475 = vmatpush1.msra.mxu1 %v369_v14  ;;  %v353_v30 = vld [vmem:[%s873_s8 + $0xb0] sm:$0xff]  ;;  %v348_v31 = vld [vmem:[%s873_s8 + $0x88] sm:$0xff]  ;;  %v350_v32 = vld [vmem:[%s873_s8 + $0x98] sm:$0xff] }
  0x43   : > { %405 = vmatprep.subr.mxu0 %v364_v15  ;;  %476 = vmatprep.subr.mxu1 %v366_v16  ;;  %v347_v33 = vld [vmem:[%s873_s8 + $0x80] sm:$0xff]  ;;  %v349_v34 = vld [vmem:[%s873_s8 + $0x90] sm:$0xff]  ;;  %v344_v35 = vld [vmem:[%s873_s8 + $0x68] sm:$0xff] }
  0x44   : > { %406 = vmatpush1.msra.mxu0 %v363_v17  ;;  %477 = vmatpush1.msra.mxu1 %v365_v18  ;;  %v346_v36 = vld [vmem:[%s873_s8 + $0x78] sm:$0xff]  ;;  %v343_v37 = vld [vmem:[%s873_s8 + $0x60] sm:$0xff]  ;;  %v345_v38 = vld [vmem:[%s873_s8 + $0x70] sm:$0xff] }
  0x45   : > { %407 = vmatprep.subr.mxu0 %v360_v19  ;;  %478 = vmatprep.subr.mxu1 %v362_v20  ;;  %v340_v39 = vld [vmem:[%s873_s8 + $0x48] sm:$0xff]  ;;  %v342_v40 = vld [vmem:[%s873_s8 + $0x58] sm:$0xff]  ;;  %v339_v41 = vld [vmem:[%s873_s8 + $0x40] sm:$0xff] }
  0x46   : > { %408 = vmatpush1.msra.mxu0 %v359_v21  ;;  %479 = vmatpush1.msra.mxu1 %v361_v22  ;;  %v341_v42 = vld [vmem:[%s873_s8 + $0x50] sm:$0xff]  ;;  %v336_v43 = vld [vmem:[%s873_s8 + $0x28] sm:$0xff]  ;;  %v338_v44 = vld [vmem:[%s873_s8 + $0x38] sm:$0xff] }
  0x47   : > { %409 = vmatprep.subr.mxu0 %v356_v23  ;;  %480 = vmatprep.subr.mxu1 %v358_v24  ;;  %v335_v45 = vld [vmem:[%s873_s8 + $0x20] sm:$0xff]  ;;  %v337_v46 = vld [vmem:[%s873_s8 + $0x30] sm:$0xff]  ;;  %v332_v47 = vld [vmem:[%s873_s8 + $0x8] sm:$0xff] }
  0x48   : > { %410 = vmatpush1.msra.mxu0 %v355_v25  ;;  %481 = vmatpush1.msra.mxu1 %v357_v26  ;;  %v334_v48 = vld [vmem:[%s873_s8 + $0x18] sm:$0xff]  ;;  %v331_v49 = vld [vmem:[%s873_s8] sm:$0xff]  ;;  %v333_v50 = vld [vmem:[%s873_s8 + $0x10] sm:$0xff] }
  0x49   : > { %411 = vmatprep.subr.mxu0 %v352_v27  ;;  %482 = vmatprep.subr.mxu1 %v354_v28  ;;  %v330_v51 = vld [vmem:[%s952_s0] sm:$0xff] }
  0x4a   : > { %412 = vmatpush1.msra.mxu0 %v351_v29  ;;  %483 = vmatpush1.msra.mxu1 %v353_v30  ;;  %v543_v52 = vld [vmem:[%s955_s3] sm:$0xff] }
  0x4b   : > { %413 = vmatprep.subr.mxu0 %v348_v31  ;;  %484 = vmatprep.subr.mxu1 %v350_v32 }
  0x4c   : > { %414 = vmatpush1.msra.mxu0 %v347_v33  ;;  %485 = vmatpush1.msra.mxu1 %v349_v34 }
  0x4d   : > { %415 = vmatprep.subr.mxu0 %v344_v35  ;;  %486 = vmatprep.subr.mxu1 %v346_v36 }
  0x4e   : > { %416 = vmatpush1.msra.mxu0 %v343_v37  ;;  %487 = vmatpush1.msra.mxu1 %v345_v38 }
  0x4f   : > { %417 = vmatprep.subr.mxu0 %v340_v39  ;;  %488 = vmatprep.subr.mxu1 %v342_v40 }
  0x50   : > { %418 = vmatpush1.msra.mxu0 %v339_v41  ;;  %489 = vmatpush1.msra.mxu1 %v341_v42 }
  0x51   : > { %419 = vmatprep.subr.mxu0 %v336_v43  ;;  %490 = vmatprep.subr.mxu1 %v338_v44 }
  0x52   : > { %420 = vmatpush1.msra.mxu0 %v335_v45  ;;  %491 = vmatpush1.msra.mxu1 %v337_v46 }
  0x53   : > { %421 = vmatprep.subr.mxu0 %v332_v47  ;;  %492 = vmatprep.subr.mxu1 %v334_v48 }
  0x54   : > { %422 = vmatpush1.msra.mxu0 %v331_v49  ;;  %493 = vmatpush1.msra.mxu1 %v333_v50 }
  0x55   : > { %632 = vmatmul.mubr.msk.f32.vlgmr.msra.gmra.mxu0 %vm387_vm0, %v330_v51  ;;  %633 = vmatmul.mubr.msk.f32.vlgmr.msra.gmra.mxu1 %vm387_vm0, %v330_v51 }
  0x56   : > { %546 = vperm.xlu0 %665, %v543_v52  }
  0xb4   : > { %v537_v53 = vpop.permute.xlu0 %536 }
  0xd1   : > { %v547_v56 = vpop.permute.xlu0 %546 }
 0x115   : > { %v457_v54 = vpop.f32.mrf.mxu0  ;;  %v528_v55 = vpop.f32.mrf.mxu1 }
 0x116   : > { %v539_v57 = vmul.f32 %v537_v53, %v457_v54  ;;  %v541_v58 = vmul.f32 %v537_v53, %v528_v55 }
 0x117   : > { %v459_v59 = vpop.f32.mrf.mxu0  ;;  %v530_v60 = vpop.f32.mrf.mxu1 }
 0x118   : > { %v549_v61 = vadd.f32 %v547_v56, %v539_v57  ;;  %v540_v62 = vmul.f32 %v537_v53, %v459_v59  ;;  %v542_v63 = vmul.f32 %v537_v53, %v530_v60  ;;  %v551_v0 = vadd.f32 %v547_v56, %v541_v58 }
 0x11a   : > { %v553_v1 = vmax.f32 %v549_v61, 0.0  ;;  %v550_v2 = vadd.f32 %v547_v56, %v540_v62  ;;  %v552_v3 = vadd.f32 %v547_v56, %v542_v63  ;;  %v555_v5 = vmax.f32 %v551_v0, 0.0 }
 0x11c   : > { %557 = vst [vmem:[%s328_s21] sm:$0xff] %v553_v1  ;;  %v554_v4 = vmax.f32 %v550_v2, 0.0  ;;  %v556_v6 = vmax.f32 %v552_v3, 0.0  ;;  %559 = vst [vmem:[%s328_s21 + $0x10] sm:$0xff] %v555_v5 }
 0x11e   : > { %558 = vst [vmem:[%s328_s21 + $0x8] sm:$0xff] %v554_v4  ;;  %560 = vst [vmem:[%s328_s21 + $0x18] sm:$0xff] %v556_v6 }
 0x11f PF: > { %p11_p9 = scmp.ge.s32.totalorder %s734_s19, 4   ;;  %s957_s15 = smov %s684_s16 }
 0x120   : > { %s958_s16 = smov %s743_s22  ;;  %s959_s17 = smov %s734_s19 }
 0x121   :  { %13 = sbr.rel (!%p11_p9) target bundleno = 2 (0x2), region = 94 }

// kernel: downsampling_block_forward.5
= control target key start
LH: loop header
LB: loop body
LE: loop exit
PB: predicated region body
PF: predicated region fallthrough
CT: control target
= control target key end

     0   :  { %s872_s15 = smov 0   ;;  %s874_s16 = smov 0   ;;  %s1266_s0 = inlined_call_operand.vmem [shape: f32[8,216], index: 0, kind: input, shape index: {}]   ;;  %s1267_s1 = inlined_call_operand.vmem [shape: f32[216,1024], index: 1, kind: input, shape index: {}]   ;;  %s1268_s2 = inlined_call_operand.vmem [shape: f32[8,1], index: 2, kind: input, shape index: {}]   ;;  %s1269_s3 = inlined_call_operand.vmem [shape: f32[8,1], index: 3, kind: input, shape index: {}]   ;;  %s1270_s4 = inlined_call_operand.vmem [shape: f32[8,1024], index: 4, kind: output, shape index: {}]  }
   0x1   :  { %s876_s17 = smov 0  }
   0x2 LB: > { %s780_s18 = sadd.s32 4294967295, %s844_s17   ;;  %s889_s19 = sadd.s32 1, %s844_s17   ;;  %s844_s17 = sphi %s876_s17, %s1273_s17   ;;  %s840_s16 = sphi %s874_s16, %s1272_s16   ;;  %s836_s15 = sphi %s872_s15, %s1271_s15  }
   0x3   : > { %s39_s20 = ssub.s32 %s844_s17, %s889_s19  ;;  %s42_s21 = sadd.s32 1, %s840_s16 }
   0x4   : > { %p40_p0 = scmp.eq.s32.totalorder %s39_s20, 0  ;;  %p49_p1 = scmp.ne.s32.totalorder %s840_s16, %s836_s15 }
   0x5   : > { %p50_p2 = scmp.eq.s32.totalorder %s844_s17, 0  ;;  %p783_p4 = scmp.ge.s32.totalorder %s844_s17, 2 }
   0x6   : > { %s898_s22 = scalar_select %p40_p0, %s840_s16, %s42_s21  }
   0x7   : > { %p51_p3 = por %p50_p2, %p49_p1  ;;  %152 = sbr.rel (%p783_p4) target bundleno = 71 (0x47), region = 28 }
   0xc   : > { %155 = sbr.rel (!%p51_p3) target bundleno = 71 (0x47), region = 32  ;;  %s157_s23 = sand.u32 (%p51_p3), 1, %s840_s16  }
   0xd   : > { %s793_s24 = sshll.u32 (%p51_p3), %s844_s17, 5  ;;  %s794_s25 = smul.u32 (%p51_p3), 864, %s157_s23 }
   0xe   : > { %s906_s28 = scalar_lea.vmem (%p51_p3), %s1267_s1, %s793_s24 }
   0xf   : > { %v175_v0 = vld [vmem:[%s906_s28] sm:$0xff] (%p51_p3)  ;;  %v177_v1 = vld [vmem:[%s906_s28 + $0x8] sm:$0xff] (%p51_p3)  ;;  %v179_v2 = vld [vmem:[%s906_s28 + $0x10] sm:$0xff] (%p51_p3)  ;;  %s914_s29 = scalar_lea.vmem (%p51_p3), [#allocation2], %s794_s25 }
  0x10   : > { %v181_v3 = vld [vmem:[%s906_s28 + $0x18] sm:$0xff] (%p51_p3)  ;;  %v183_v4 = vld [vmem:[%s906_s28 + $0x40] sm:$0xff] (%p51_p3)  ;;  %v185_v5 = vld [vmem:[%s906_s28 + $0x48] sm:$0xff] (%p51_p3)  ;;  %176 = vst [vmem:[%s914_s29] sm:$0xff] (%p51_p3), %v175_v0 }
  0x11   : > { %178 = vst [vmem:[%s914_s29 + $0x8] sm:$0xff] %v177_v1  ;;  %180 = vst [vmem:[%s914_s29 + $0x10] sm:$0xff] %v179_v2  ;;  %v187_v6 = vld [vmem:[%s906_s28 + $0x50] sm:$0xff]  ;;  %v189_v7 = vld [vmem:[%s906_s28 + $0x58] sm:$0xff] }
  0x12   : > { %182 = vst [vmem:[%s914_s29 + $0x18] sm:$0xff] %v181_v3  ;;  %184 = vst [vmem:[%s914_s29 + $0x20] sm:$0xff] %v183_v4  ;;  %v191_v8 = vld [vmem:[%s906_s28 + $0x80] sm:$0xff]  ;;  %v193_v9 = vld [vmem:[%s906_s28 + $0x88] sm:$0xff] }
  0x13   : > { %186 = vst [vmem:[%s914_s29 + $0x28] sm:$0xff] %v185_v5  ;;  %188 = vst [vmem:[%s914_s29 + $0x30] sm:$0xff] %v187_v6  ;;  %v195_v10 = vld [vmem:[%s906_s28 + $0x90] sm:$0xff]  ;;  %v197_v11 = vld [vmem:[%s906_s28 + $0x98] sm:$0xff] }
  0x14   : > { %190 = vst [vmem:[%s914_s29 + $0x38] sm:$0xff] %v189_v7  ;;  %192 = vst [vmem:[%s914_s29 + $0x40] sm:$0xff] %v191_v8  ;;  %v199_v12 = vld [vmem:[%s906_s28 + $0xc0] sm:$0xff]  ;;  %v201_v13 = vld [vmem:[%s906_s28 + $0xc8] sm:$0xff] }
  0x15   : > { %194 = vst [vmem:[%s914_s29 + $0x48] sm:$0xff] %v193_v9  ;;  %196 = vst [vmem:[%s914_s29 + $0x50] sm:$0xff] %v195_v10  ;;  %v203_v14 = vld [vmem:[%s906_s28 + $0xd0] sm:$0xff]  ;;  %v205_v15 = vld [vmem:[%s906_s28 + $0xd8] sm:$0xff] }
  0x16   : > { %198 = vst [vmem:[%s914_s29 + $0x58] sm:$0xff] %v197_v11  ;;  %200 = vst [vmem:[%s914_s29 + $0x60] sm:$0xff] %v199_v12  ;;  %v207_v16 = vld [vmem:[%s906_s28 + $0x100] sm:$0xff]  ;;  %v209_v17 = vld [vmem:[%s906_s28 + $0x108] sm:$0xff] }
  0x17   : > { %202 = vst [vmem:[%s914_s29 + $0x68] sm:$0xff] %v201_v13  ;;  %204 = vst [vmem:[%s914_s29 + $0x70] sm:$0xff] %v203_v14  ;;  %v211_v18 = vld [vmem:[%s906_s28 + $0x110] sm:$0xff]  ;;  %v213_v19 = vld [vmem:[%s906_s28 + $0x118] sm:$0xff] }
  0x18   : > { %206 = vst [vmem:[%s914_s29 + $0x78] sm:$0xff] %v205_v15  ;;  %208 = vst [vmem:[%s914_s29 + $0x80] sm:$0xff] %v207_v16  ;;  %v215_v20 = vld [vmem:[%s906_s28 + $0x140] sm:$0xff]  ;;  %v217_v21 = vld [vmem:[%s906_s28 + $0x148] sm:$0xff] }
  0x19   : > { %210 = vst [vmem:[%s914_s29 + $0x88] sm:$0xff] %v209_v17  ;;  %212 = vst [vmem:[%s914_s29 + $0x90] sm:$0xff] %v211_v18  ;;  %v219_v22 = vld [vmem:[%s906_s28 + $0x150] sm:$0xff]  ;;  %v221_v23 = vld [vmem:[%s906_s28 + $0x158] sm:$0xff] }
  0x1a   : > { %214 = vst [vmem:[%s914_s29 + $0x98] sm:$0xff] %v213_v19  ;;  %216 = vst [vmem:[%s914_s29 + $0xa0] sm:$0xff] %v215_v20  ;;  %v223_v24 = vld [vmem:[%s906_s28 + $0x180] sm:$0xff]  ;;  %v225_v25 = vld [vmem:[%s906_s28 + $0x188] sm:$0xff] }
  0x1b   : > { %218 = vst [vmem:[%s914_s29 + $0xa8] sm:$0xff] %v217_v21  ;;  %220 = vst [vmem:[%s914_s29 + $0xb0] sm:$0xff] %v219_v22  ;;  %v227_v26 = vld [vmem:[%s906_s28 + $0x190] sm:$0xff]  ;;  %v229_v27 = vld [vmem:[%s906_s28 + $0x198] sm:$0xff] }
  0x1c   : > { %222 = vst [vmem:[%s914_s29 + $0xb8] sm:$0xff] %v221_v23  ;;  %224 = vst [vmem:[%s914_s29 + $0xc0] sm:$0xff] %v223_v24  ;;  %v231_v28 = vld [vmem:[%s906_s28 + $0x1c0] sm:$0xff]  ;;  %v233_v29 = vld [vmem:[%s906_s28 + $0x1c8] sm:$0xff] }
  0x1d   : > { %226 = vst [vmem:[%s914_s29 + $0xc8] sm:$0xff] %v225_v25  ;;  %228 = vst [vmem:[%s914_s29 + $0xd0] sm:$0xff] %v227_v26  ;;  %v235_v30 = vld [vmem:[%s906_s28 + $0x1d0] sm:$0xff]  ;;  %v237_v31 = vld [vmem:[%s906_s28 + $0x1d8] sm:$0xff] }
  0x1e   : > { %230 = vst [vmem:[%s914_s29 + $0xd8] sm:$0xff] %v229_v27  ;;  %232 = vst [vmem:[%s914_s29 + $0xe0] sm:$0xff] %v231_v28  ;;  %v239_v32 = vld [vmem:[%s906_s28 + $0x200] sm:$0xff]  ;;  %v241_v33 = vld [vmem:[%s906_s28 + $0x208] sm:$0xff] }
  0x1f   : > { %234 = vst [vmem:[%s914_s29 + $0xe8] sm:$0xff] %v233_v29  ;;  %236 = vst [vmem:[%s914_s29 + $0xf0] sm:$0xff] %v235_v30  ;;  %v243_v34 = vld [vmem:[%s906_s28 + $0x210] sm:$0xff]  ;;  %v245_v35 = vld [vmem:[%s906_s28 + $0x218] sm:$0xff] }
  0x20   : > { %238 = vst [vmem:[%s914_s29 + $0xf8] sm:$0xff] %v237_v31  ;;  %240 = vst [vmem:[%s914_s29 + $0x100] sm:$0xff] %v239_v32  ;;  %v247_v36 = vld [vmem:[%s906_s28 + $0x240] sm:$0xff]  ;;  %v249_v37 = vld [vmem:[%s906_s28 + $0x248] sm:$0xff] }
  0x21   : > { %242 = vst [vmem:[%s914_s29 + $0x108] sm:$0xff] %v241_v33  ;;  %244 = vst [vmem:[%s914_s29 + $0x110] sm:$0xff] %v243_v34  ;;  %v251_v38 = vld [vmem:[%s906_s28 + $0x250] sm:$0xff]  ;;  %v253_v39 = vld [vmem:[%s906_s28 + $0x258] sm:$0xff] }
  0x22   : > { %246 = vst [vmem:[%s914_s29 + $0x118] sm:$0xff] %v245_v35  ;;  %248 = vst [vmem:[%s914_s29 + $0x120] sm:$0xff] %v247_v36  ;;  %v255_v40 = vld [vmem:[%s906_s28 + $0x280] sm:$0xff]  ;;  %v257_v41 = vld [vmem:[%s906_s28 + $0x288] sm:$0xff] }
  0x23   : > { %250 = vst [vmem:[%s914_s29 + $0x128] sm:$0xff] %v249_v37  ;;  %252 = vst [vmem:[%s914_s29 + $0x130] sm:$0xff] %v251_v38  ;;  %v259_v42 = vld [vmem:[%s906_s28 + $0x290] sm:$0xff]  ;;  %v261_v43 = vld [vmem:[%s906_s28 + $0x298] sm:$0xff] }
  0x24   : > { %254 = vst [vmem:[%s914_s29 + $0x138] sm:$0xff] %v253_v39  ;;  %256 = vst [vmem:[%s914_s29 + $0x140] sm:$0xff] %v255_v40  ;;  %v263_v44 = vld [vmem:[%s906_s28 + $0x2c0] sm:$0xff]  ;;  %v265_v45 = vld [vmem:[%s906_s28 + $0x2c8] sm:$0xff] }
  0x25   : > { %258 = vst [vmem:[%s914_s29 + $0x148] sm:$0xff] %v257_v41  ;;  %260 = vst [vmem:[%s914_s29 + $0x150] sm:$0xff] %v259_v42  ;;  %v267_v46 = vld [vmem:[%s906_s28 + $0x2d0] sm:$0xff]  ;;  %v269_v47 = vld [vmem:[%s906_s28 + $0x2d8] sm:$0xff] }
  0x26   : > { %262 = vst [vmem:[%s914_s29 + $0x158] sm:$0xff] %v261_v43  ;;  %264 = vst [vmem:[%s914_s29 + $0x160] sm:$0xff] %v263_v44  ;;  %v271_v48 = vld [vmem:[%s906_s28 + $0x300] sm:$0xff]  ;;  %v273_v49 = vld [vmem:[%s906_s28 + $0x308] sm:$0xff] }
  0x27   : > { %266 = vst [vmem:[%s914_s29 + $0x168] sm:$0xff] %v265_v45  ;;  %268 = vst [vmem:[%s914_s29 + $0x170] sm:$0xff] %v267_v46  ;;  %v275_v50 = vld [vmem:[%s906_s28 + $0x310] sm:$0xff]  ;;  %v277_v51 = vld [vmem:[%s906_s28 + $0x318] sm:$0xff] }
  0x28   : > { %270 = vst [vmem:[%s914_s29 + $0x178] sm:$0xff] %v269_v47  ;;  %272 = vst [vmem:[%s914_s29 + $0x180] sm:$0xff] %v271_v48  ;;  %v279_v52 = vld [vmem:[%s906_s28 + $0x340] sm:$0xff]  ;;  %v281_v53 = vld [vmem:[%s906_s28 + $0x348] sm:$0xff] }
  0x29   : > { %274 = vst [vmem:[%s914_s29 + $0x188] sm:$0xff] %v273_v49  ;;  %276 = vst [vmem:[%s914_s29 + $0x190] sm:$0xff] %v275_v50  ;;  %v283_v54 = vld [vmem:[%s906_s28 + $0x350] sm:$0xff]  ;;  %v285_v55 = vld [vmem:[%s906_s28 + $0x358] sm:$0xff] }
  0x2a   : > { %278 = vst [vmem:[%s914_s29 + $0x198] sm:$0xff] %v277_v51  ;;  %280 = vst [vmem:[%s914_s29 + $0x1a0] sm:$0xff] %v279_v52  ;;  %v287_v56 = vld [vmem:[%s906_s28 + $0x380] sm:$0xff]  ;;  %v289_v57 = vld [vmem:[%s906_s28 + $0x388] sm:$0xff] }
  0x2b   : > { %282 = vst [vmem:[%s914_s29 + $0x1a8] sm:$0xff] %v281_v53  ;;  %284 = vst [vmem:[%s914_s29 + $0x1b0] sm:$0xff] %v283_v54  ;;  %v291_v58 = vld [vmem:[%s906_s28 + $0x390] sm:$0xff]  ;;  %v293_v59 = vld [vmem:[%s906_s28 + $0x398] sm:$0xff] }
  0x2c   : > { %286 = vst [vmem:[%s914_s29 + $0x1b8] sm:$0xff] %v285_v55  ;;  %288 = vst [vmem:[%s914_s29 + $0x1c0] sm:$0xff] %v287_v56  ;;  %v295_v60 = vld [vmem:[%s906_s28 + $0x3c0] sm:$0xff]  ;;  %v297_v61 = vld [vmem:[%s906_s28 + $0x3c8] sm:$0xff] }
  0x2d   : > { %290 = vst [vmem:[%s914_s29 + $0x1c8] sm:$0xff] %v289_v57  ;;  %292 = vst [vmem:[%s914_s29 + $0x1d0] sm:$0xff] %v291_v58  ;;  %v299_v62 = vld [vmem:[%s906_s28 + $0x3d0] sm:$0xff]  ;;  %v301_v63 = vld [vmem:[%s906_s28 + $0x3d8] sm:$0xff] }
  0x2e   : > { %294 = vst [vmem:[%s914_s29 + $0x1d8] sm:$0xff] %v293_v59  ;;  %296 = vst [vmem:[%s914_s29 + $0x1e0] sm:$0xff] %v295_v60  ;;  %v303_v0 = vld [vmem:[%s906_s28 + $0x400] sm:$0xff]  ;;  %v305_v1 = vld [vmem:[%s906_s28 + $0x408] sm:$0xff] }
  0x2f   : > { %298 = vst [vmem:[%s914_s29 + $0x1e8] sm:$0xff] %v297_v61  ;;  %300 = vst [vmem:[%s914_s29 + $0x1f0] sm:$0xff] %v299_v62  ;;  %v307_v2 = vld [vmem:[%s906_s28 + $0x410] sm:$0xff]  ;;  %v309_v3 = vld [vmem:[%s906_s28 + $0x418] sm:$0xff] }
  0x30   : > { %302 = vst [vmem:[%s914_s29 + $0x1f8] sm:$0xff] %v301_v63  ;;  %304 = vst [vmem:[%s914_s29 + $0x200] sm:$0xff] %v303_v0  ;;  %v311_v4 = vld [vmem:[%s906_s28 + $0x440] sm:$0xff]  ;;  %v313_v5 = vld [vmem:[%s906_s28 + $0x448] sm:$0xff] }
  0x31   : > { %306 = vst [vmem:[%s914_s29 + $0x208] sm:$0xff] %v305_v1  ;;  %308 = vst [vmem:[%s914_s29 + $0x210] sm:$0xff] %v307_v2  ;;  %v315_v6 = vld [vmem:[%s906_s28 + $0x450] sm:$0xff]  ;;  %v317_v7 = vld [vmem:[%s906_s28 + $0x458] sm:$0xff] }
  0x32   : > { %310 = vst [vmem:[%s914_s29 + $0x218] sm:$0xff] %v309_v3  ;;  %312 = vst [vmem:[%s914_s29 + $0x220] sm:$0xff] %v311_v4  ;;  %v319_v8 = vld [vmem:[%s906_s28 + $0x480] sm:$0xff]  ;;  %v321_v9 = vld [vmem:[%s906_s28 + $0x488] sm:$0xff] }
  0x33   : > { %314 = vst [vmem:[%s914_s29 + $0x228] sm:$0xff] %v313_v5  ;;  %316 = vst [vmem:[%s914_s29 + $0x230] sm:$0xff] %v315_v6  ;;  %v323_v10 = vld [vmem:[%s906_s28 + $0x490] sm:$0xff]  ;;  %v325_v11 = vld [vmem:[%s906_s28 + $0x498] sm:$0xff] }
  0x34   : > { %318 = vst [vmem:[%s914_s29 + $0x238] sm:$0xff] %v317_v7  ;;  %320 = vst [vmem:[%s914_s29 + $0x240] sm:$0xff] %v319_v8  ;;  %v327_v12 = vld [vmem:[%s906_s28 + $0x4c0] sm:$0xff]  ;;  %v329_v13 = vld [vmem:[%s906_s28 + $0x4c8] sm:$0xff] }
  0x35   : > { %322 = vst [vmem:[%s914_s29 + $0x248] sm:$0xff] %v321_v9  ;;  %324 = vst [vmem:[%s914_s29 + $0x250] sm:$0xff] %v323_v10  ;;  %v331_v14 = vld [vmem:[%s906_s28 + $0x4d0] sm:$0xff]  ;;  %v333_v15 = vld [vmem:[%s906_s28 + $0x4d8] sm:$0xff] }
  0x36   : > { %326 = vst [vmem:[%s914_s29 + $0x258] sm:$0xff] %v325_v11  ;;  %328 = vst [vmem:[%s914_s29 + $0x260] sm:$0xff] %v327_v12  ;;  %v335_v16 = vld [vmem:[%s906_s28 + $0x500] sm:$0xff]  ;;  %v337_v17 = vld [vmem:[%s906_s28 + $0x508] sm:$0xff] }
  0x37   : > { %330 = vst [vmem:[%s914_s29 + $0x268] sm:$0xff] %v329_v13  ;;  %332 = vst [vmem:[%s914_s29 + $0x270] sm:$0xff] %v331_v14  ;;  %v339_v18 = vld [vmem:[%s906_s28 + $0x510] sm:$0xff]  ;;  %v341_v19 = vld [vmem:[%s906_s28 + $0x518] sm:$0xff] }
  0x38   : > { %334 = vst [vmem:[%s914_s29 + $0x278] sm:$0xff] %v333_v15  ;;  %336 = vst [vmem:[%s914_s29 + $0x280] sm:$0xff] %v335_v16  ;;  %v343_v20 = vld [vmem:[%s906_s28 + $0x540] sm:$0xff]  ;;  %v345_v21 = vld [vmem:[%s906_s28 + $0x548] sm:$0xff] }
  0x39   : > { %338 = vst [vmem:[%s914_s29 + $0x288] sm:$0xff] %v337_v17  ;;  %340 = vst [vmem:[%s914_s29 + $0x290] sm:$0xff] %v339_v18  ;;  %v347_v22 = vld [vmem:[%s906_s28 + $0x550] sm:$0xff]  ;;  %v349_v23 = vld [vmem:[%s906_s28 + $0x558] sm:$0xff] }
  0x3a   : > { %342 = vst [vmem:[%s914_s29 + $0x298] sm:$0xff] %v341_v19  ;;  %344 = vst [vmem:[%s914_s29 + $0x2a0] sm:$0xff] %v343_v20  ;;  %v351_v24 = vld [vmem:[%s906_s28 + $0x580] sm:$0xff]  ;;  %v353_v25 = vld [vmem:[%s906_s28 + $0x588] sm:$0xff] }
  0x3b   : > { %346 = vst [vmem:[%s914_s29 + $0x2a8] sm:$0xff] %v345_v21  ;;  %348 = vst [vmem:[%s914_s29 + $0x2b0] sm:$0xff] %v347_v22  ;;  %v355_v26 = vld [vmem:[%s906_s28 + $0x590] sm:$0xff]  ;;  %v357_v27 = vld [vmem:[%s906_s28 + $0x598] sm:$0xff] }
  0x3c   : > { %350 = vst [vmem:[%s914_s29 + $0x2b8] sm:$0xff] %v349_v23  ;;  %352 = vst [vmem:[%s914_s29 + $0x2c0] sm:$0xff] %v351_v24  ;;  %v359_v28 = vld [vmem:[%s906_s28 + $0x5c0] sm:$0xff]  ;;  %v361_v29 = vld [vmem:[%s906_s28 + $0x5c8] sm:$0xff] }
  0x3d   : > { %354 = vst [vmem:[%s914_s29 + $0x2c8] sm:$0xff] %v353_v25  ;;  %356 = vst [vmem:[%s914_s29 + $0x2d0] sm:$0xff] %v355_v26  ;;  %v363_v30 = vld [vmem:[%s906_s28 + $0x5d0] sm:$0xff]  ;;  %v365_v31 = vld [vmem:[%s906_s28 + $0x5d8] sm:$0xff] }
  0x3e   : > { %358 = vst [vmem:[%s914_s29 + $0x2d8] sm:$0xff] %v357_v27  ;;  %360 = vst [vmem:[%s914_s29 + $0x2e0] sm:$0xff] %v359_v28  ;;  %v367_v32 = vld [vmem:[%s906_s28 + $0x600] sm:$0xff]  ;;  %v369_v33 = vld [vmem:[%s906_s28 + $0x608] sm:$0xff] }
  0x3f   : > { %362 = vst [vmem:[%s914_s29 + $0x2e8] sm:$0xff] %v361_v29  ;;  %364 = vst [vmem:[%s914_s29 + $0x2f0] sm:$0xff] %v363_v30  ;;  %v371_v34 = vld [vmem:[%s906_s28 + $0x610] sm:$0xff]  ;;  %v373_v35 = vld [vmem:[%s906_s28 + $0x618] sm:$0xff] }
  0x40   : > { %366 = vst [vmem:[%s914_s29 + $0x2f8] sm:$0xff] %v365_v31  ;;  %368 = vst [vmem:[%s914_s29 + $0x300] sm:$0xff] %v367_v32  ;;  %v375_v36 = vld [vmem:[%s906_s28 + $0x640] sm:$0xff]  ;;  %v377_v37 = vld [vmem:[%s906_s28 + $0x648] sm:$0xff] }
  0x41   : > { %370 = vst [vmem:[%s914_s29 + $0x308] sm:$0xff] %v369_v33  ;;  %372 = vst [vmem:[%s914_s29 + $0x310] sm:$0xff] %v371_v34  ;;  %v379_v38 = vld [vmem:[%s906_s28 + $0x650] sm:$0xff]  ;;  %v381_v39 = vld [vmem:[%s906_s28 + $0x658] sm:$0xff] }
  0x42   : > { %374 = vst [vmem:[%s914_s29 + $0x318] sm:$0xff] %v373_v35  ;;  %376 = vst [vmem:[%s914_s29 + $0x320] sm:$0xff] %v375_v36  ;;  %v383_v40 = vld [vmem:[%s906_s28 + $0x680] sm:$0xff]  ;;  %v385_v41 = vld [vmem:[%s906_s28 + $0x688] sm:$0xff] }
  0x43   : > { %378 = vst [vmem:[%s914_s29 + $0x328] sm:$0xff] %v377_v37  ;;  %380 = vst [vmem:[%s914_s29 + $0x330] sm:$0xff] %v379_v38  ;;  %v387_v42 = vld [vmem:[%s906_s28 + $0x690] sm:$0xff]  ;;  %v389_v43 = vld [vmem:[%s906_s28 + $0x698] sm:$0xff] }
  0x44   : > { %382 = vst [vmem:[%s914_s29 + $0x338] sm:$0xff] %v381_v39  ;;  %384 = vst [vmem:[%s914_s29 + $0x340] sm:$0xff] %v383_v40 }
  0x45   : > { %386 = vst [vmem:[%s914_s29 + $0x348] sm:$0xff] %v385_v41  ;;  %388 = vst [vmem:[%s914_s29 + $0x350] sm:$0xff] %v387_v42 }
  0x46   : > { %390 = vst [vmem:[%s914_s29 + $0x358] sm:$0xff] %v389_v43 }
  0x47 PF: > { %p786_p5 = scmp.ge.s32.totalorder %s844_s17, 1  ;;  %p395_p6 = scmp.lt.s32.totalorder %s844_s17, 3 }
  0x49   : > { %p396_p7 = pnand %p786_p5, %p395_p6 }
  0x4a   : > { %s402_s30 = sand.u32 (!%p396_p7), 1, %s836_s15   ;;  %s787_s15 = sshll.u32 (!%p396_p7), %s780_s18, 2 }
  0x4b   : > { %399 = sbr.rel (%p396_p7) target bundleno = 339 (0x153), region = 55  ;;  %p429_p8 = scmp.lt.s32.totalorder (!%p396_p7), %s787_s15, 7 }
  0x4c   : > { %s795_s9 = smul.u32 (!%p396_p7), 864, %s402_s30 }
  0x4e   : > { %s1135_s10 = scalar_lea.vmem (!%p396_p7), [#allocation2], %s795_s9 }
  0x50   : > { %v435_v44 = vld [vmem:[%s1266_s0 + $0x8] sm:$0xff]  ;;  %vm544_vm0 = vcmask 719872   ;;  %v690_v45 = vld [vmem:[%s1268_s2] sm:$0xff]  ;;  %v846_v46 = vmov 0   ;;  %v499_v48 = vld [vmem:[%s1135_s10 + $0x1f8] sm:$0xff]  ;;  %s1275_s15 = smov (!%p429_p8, %s787_s15), 7 }
  0x51   : > { %789 = vmatprep.mubr.msk.f32.mxu0 %vm544_vm0, %v435_v44  ;;  %790 = vmatprep.mubr.msk.f32.mxu1 %vm544_vm0, %v435_v44  ;;  %v497_v47 = vld [vmem:[%s1135_s10 + $0x1e8] sm:$0xff]  ;;  %v496_v49 = vld [vmem:[%s1135_s10 + $0x1e0] sm:$0xff]  ;;  %v498_v50 = vld [vmem:[%s1135_s10 + $0x1f0] sm:$0xff]  ;;  %s788_s20 = sshll.u32 %s1275_s15, 3 }
  0x52   : > { %821 = vset.pattern.permute.xlu0 %v846_v46  ;;  %548 = vmatprep.subr.mxu0 %v497_v47  ;;  %v493_v51 = vld [vmem:[%s1135_s10 + $0x1c8] sm:$0xff]  ;;  %v495_v52 = vld [vmem:[%s1135_s10 + $0x1d8] sm:$0xff]  ;;  %v492_v53 = vld [vmem:[%s1135_s10 + $0x1c0] sm:$0xff]  ;;  %s432_s24 = scalar_lea.vmem %s1270_s4, %s788_s20 }
  0x53   : > { %693 = vperm.xlu0 %821, %v690_v45   ;;  %619 = vmatprep.subr.mxu1 %v499_v48  ;;  %v494_v54 = vld [vmem:[%s1135_s10 + $0x1d0] sm:$0xff]  ;;  %v489_v55 = vld [vmem:[%s1135_s10 + $0x1a8] sm:$0xff]  ;;  %v491_v56 = vld [vmem:[%s1135_s10 + $0x1b8] sm:$0xff] }
  0x54   : > { %549 = vmatpush1.msra.mxu0 %v496_v49  ;;  %620 = vmatpush1.msra.mxu1 %v498_v50  ;;  %v488_v57 = vld [vmem:[%s1135_s10 + $0x1a0] sm:$0xff]  ;;  %v490_v58 = vld [vmem:[%s1135_s10 + $0x1b0] sm:$0xff]  ;;  %v485_v59 = vld [vmem:[%s1135_s10 + $0x188] sm:$0xff] }
  0x55   : > { %550 = vmatprep.subr.mxu0 %v493_v51  ;;  %621 = vmatprep.subr.mxu1 %v495_v52  ;;  %v487_v60 = vld [vmem:[%s1135_s10 + $0x198] sm:$0xff]  ;;  %v484_v61 = vld [vmem:[%s1135_s10 + $0x180] sm:$0xff]  ;;  %v486_v62 = vld [vmem:[%s1135_s10 + $0x190] sm:$0xff] }
  0x56   : > { %551 = vmatpush1.msra.mxu0 %v492_v53  ;;  %622 = vmatpush1.msra.mxu1 %v494_v54  ;;  %v481_v63 = vld [vmem:[%s1135_s10 + $0x168] sm:$0xff]  ;;  %v483_v0 = vld [vmem:[%s1135_s10 + $0x178] sm:$0xff]  ;;  %v480_v1 = vld [vmem:[%s1135_s10 + $0x160] sm:$0xff] }
  0x57   : > { %552 = vmatprep.subr.mxu0 %v489_v55  ;;  %623 = vmatprep.subr.mxu1 %v491_v56  ;;  %v482_v2 = vld [vmem:[%s1135_s10 + $0x170] sm:$0xff]  ;;  %v477_v3 = vld [vmem:[%s1135_s10 + $0x148] sm:$0xff]  ;;  %v479_v4 = vld [vmem:[%s1135_s10 + $0x158] sm:$0xff] }
  0x58   : > { %553 = vmatpush1.msra.mxu0 %v488_v57  ;;  %624 = vmatpush1.msra.mxu1 %v490_v58  ;;  %v476_v5 = vld [vmem:[%s1135_s10 + $0x140] sm:$0xff]  ;;  %v478_v6 = vld [vmem:[%s1135_s10 + $0x150] sm:$0xff]  ;;  %v473_v7 = vld [vmem:[%s1135_s10 + $0x128] sm:$0xff] }
  0x59   : > { %554 = vmatprep.subr.mxu0 %v485_v59  ;;  %625 = vmatprep.subr.mxu1 %v487_v60  ;;  %v475_v8 = vld [vmem:[%s1135_s10 + $0x138] sm:$0xff]  ;;  %v472_v9 = vld [vmem:[%s1135_s10 + $0x120] sm:$0xff]  ;;  %v474_v10 = vld [vmem:[%s1135_s10 + $0x130] sm:$0xff] }
  0x5a   : > { %555 = vmatpush1.msra.mxu0 %v484_v61  ;;  %626 = vmatpush1.msra.mxu1 %v486_v62  ;;  %v469_v11 = vld [vmem:[%s1135_s10 + $0x108] sm:$0xff]  ;;  %v471_v12 = vld [vmem:[%s1135_s10 + $0x118] sm:$0xff]  ;;  %v468_v13 = vld [vmem:[%s1135_s10 + $0x100] sm:$0xff] }
  0x5b   : > { %556 = vmatprep.subr.mxu0 %v481_v63  ;;  %627 = vmatprep.subr.mxu1 %v483_v0  ;;  %v470_v14 = vld [vmem:[%s1135_s10 + $0x110] sm:$0xff]  ;;  %v465_v15 = vld [vmem:[%s1135_s10 + $0xe8] sm:$0xff]  ;;  %v467_v16 = vld [vmem:[%s1135_s10 + $0xf8] sm:$0xff] }
  0x5c   : > { %557 = vmatpush1.msra.mxu0 %v480_v1  ;;  %628 = vmatpush1.msra.mxu1 %v482_v2  ;;  %v464_v17 = vld [vmem:[%s1135_s10 + $0xe0] sm:$0xff]  ;;  %v466_v18 = vld [vmem:[%s1135_s10 + $0xf0] sm:$0xff]  ;;  %v461_v19 = vld [vmem:[%s1135_s10 + $0xc8] sm:$0xff] }
  0x5d   : > { %558 = vmatprep.subr.mxu0 %v477_v3  ;;  %629 = vmatprep.subr.mxu1 %v479_v4  ;;  %v463_v20 = vld [vmem:[%s1135_s10 + $0xd8] sm:$0xff]  ;;  %v460_v21 = vld [vmem:[%s1135_s10 + $0xc0] sm:$0xff]  ;;  %v462_v22 = vld [vmem:[%s1135_s10 + $0xd0] sm:$0xff] }
  0x5e   : > { %559 = vmatpush1.msra.mxu0 %v476_v5  ;;  %630 = vmatpush1.msra.mxu1 %v478_v6  ;;  %v457_v23 = vld [vmem:[%s1135_s10 + $0xa8] sm:$0xff]  ;;  %v459_v24 = vld [vmem:[%s1135_s10 + $0xb8] sm:$0xff]  ;;  %v456_v25 = vld [vmem:[%s1135_s10 + $0xa0] sm:$0xff] }
  0x5f   : > { %560 = vmatprep.subr.mxu0 %v473_v7  ;;  %631 = vmatprep.subr.mxu1 %v475_v8  ;;  %v458_v26 = vld [vmem:[%s1135_s10 + $0xb0] sm:$0xff]  ;;  %v453_v27 = vld [vmem:[%s1135_s10 + $0x88] sm:$0xff]  ;;  %v455_v28 = vld [vmem:[%s1135_s10 + $0x98] sm:$0xff] }
  0x60   : > { %561 = vmatpush1.msra.mxu0 %v472_v9  ;;  %632 = vmatpush1.msra.mxu1 %v474_v10  ;;  %v452_v29 = vld [vmem:[%s1135_s10 + $0x80] sm:$0xff]  ;;  %v454_v30 = vld [vmem:[%s1135_s10 + $0x90] sm:$0xff]  ;;  %v449_v31 = vld [vmem:[%s1135_s10 + $0x68] sm:$0xff] }
  0x61   : > { %562 = vmatprep.subr.mxu0 %v469_v11  ;;  %633 = vmatprep.subr.mxu1 %v471_v12  ;;  %v451_v32 = vld [vmem:[%s1135_s10 + $0x78] sm:$0xff]  ;;  %v448_v33 = vld [vmem:[%s1135_s10 + $0x60] sm:$0xff]  ;;  %v450_v34 = vld [vmem:[%s1135_s10 + $0x70] sm:$0xff] }
  0x62   : > { %563 = vmatpush1.msra.mxu0 %v468_v13  ;;  %634 = vmatpush1.msra.mxu1 %v470_v14  ;;  %v445_v35 = vld [vmem:[%s1135_s10 + $0x48] sm:$0xff]  ;;  %v447_v36 = vld [vmem:[%s1135_s10 + $0x58] sm:$0xff]  ;;  %v444_v37 = vld [vmem:[%s1135_s10 + $0x40] sm:$0xff] }
  0x63   : > { %564 = vmatprep.subr.mxu0 %v465_v15  ;;  %635 = vmatprep.subr.mxu1 %v467_v16  ;;  %v446_v38 = vld [vmem:[%s1135_s10 + $0x50] sm:$0xff]  ;;  %v441_v39 = vld [vmem:[%s1135_s10 + $0x28] sm:$0xff]  ;;  %v443_v40 = vld [vmem:[%s1135_s10 + $0x38] sm:$0xff] }
  0x64   : > { %565 = vmatpush1.msra.mxu0 %v464_v17  ;;  %636 = vmatpush1.msra.mxu1 %v466_v18  ;;  %v440_v41 = vld [vmem:[%s1135_s10 + $0x20] sm:$0xff]  ;;  %v442_v42 = vld [vmem:[%s1135_s10 + $0x30] sm:$0xff]  ;;  %v437_v43 = vld [vmem:[%s1135_s10 + $0x8] sm:$0xff] }
  0x65   : > { %566 = vmatprep.subr.mxu0 %v461_v19  ;;  %637 = vmatprep.subr.mxu1 %v463_v20  ;;  %v439_v44 = vld [vmem:[%s1135_s10 + $0x18] sm:$0xff]  ;;  %v436_v45 = vld [vmem:[%s1135_s10] sm:$0xff]  ;;  %v438_v46 = vld [vmem:[%s1135_s10 + $0x10] sm:$0xff] }
  0x66   : > { %567 = vmatpush1.msra.mxu0 %v460_v21  ;;  %638 = vmatpush1.msra.mxu1 %v462_v22  ;;  %v541_v47 = vld [vmem:[%s1135_s10 + $0x348] sm:$0xff]  ;;  %v543_v48 = vld [vmem:[%s1135_s10 + $0x358] sm:$0xff]  ;;  %v540_v49 = vld [vmem:[%s1135_s10 + $0x340] sm:$0xff] }
  0x67   : > { %568 = vmatprep.subr.mxu0 %v457_v23  ;;  %639 = vmatprep.subr.mxu1 %v459_v24  ;;  %v542_v50 = vld [vmem:[%s1135_s10 + $0x350] sm:$0xff]  ;;  %v537_v51 = vld [vmem:[%s1135_s10 + $0x328] sm:$0xff]  ;;  %v539_v52 = vld [vmem:[%s1135_s10 + $0x338] sm:$0xff] }
  0x68   : > { %569 = vmatpush1.msra.mxu0 %v456_v25  ;;  %640 = vmatpush1.msra.mxu1 %v458_v26  ;;  %v536_v53 = vld [vmem:[%s1135_s10 + $0x320] sm:$0xff]  ;;  %v538_v54 = vld [vmem:[%s1135_s10 + $0x330] sm:$0xff]  ;;  %v533_v55 = vld [vmem:[%s1135_s10 + $0x308] sm:$0xff] }
  0x69   : > { %570 = vmatprep.subr.mxu0 %v453_v27  ;;  %641 = vmatprep.subr.mxu1 %v455_v28  ;;  %v535_v56 = vld [vmem:[%s1135_s10 + $0x318] sm:$0xff]  ;;  %v532_v57 = vld [vmem:[%s1135_s10 + $0x300] sm:$0xff]  ;;  %v534_v58 = vld [vmem:[%s1135_s10 + $0x310] sm:$0xff] }
  0x6a   : > { %571 = vmatpush1.msra.mxu0 %v452_v29  ;;  %642 = vmatpush1.msra.mxu1 %v454_v30  ;;  %v529_v59 = vld [vmem:[%s1135_s10 + $0x2e8] sm:$0xff]  ;;  %v531_v60 = vld [vmem:[%s1135_s10 + $0x2f8] sm:$0xff]  ;;  %v528_v61 = vld [vmem:[%s1135_s10 + $0x2e0] sm:$0xff] }
  0x6b   : > { %572 = vmatprep.subr.mxu0 %v449_v31  ;;  %643 = vmatprep.subr.mxu1 %v451_v32  ;;  %v530_v62 = vld [vmem:[%s1135_s10 + $0x2f0] sm:$0xff]  ;;  %v525_v63 = vld [vmem:[%s1135_s10 + $0x2c8] sm:$0xff]  ;;  %v527_v0 = vld [vmem:[%s1135_s10 + $0x2d8] sm:$0xff] }
  0x6c   : > { %573 = vmatpush1.msra.mxu0 %v448_v33  ;;  %644 = vmatpush1.msra.mxu1 %v450_v34  ;;  %v524_v1 = vld [vmem:[%s1135_s10 + $0x2c0] sm:$0xff]  ;;  %v526_v2 = vld [vmem:[%s1135_s10 + $0x2d0] sm:$0xff]  ;;  %v521_v3 = vld [vmem:[%s1135_s10 + $0x2a8] sm:$0xff] }
  0x6d   : > { %574 = vmatprep.subr.mxu0 %v445_v35  ;;  %645 = vmatprep.subr.mxu1 %v447_v36  ;;  %v523_v4 = vld [vmem:[%s1135_s10 + $0x2b8] sm:$0xff]  ;;  %v520_v5 = vld [vmem:[%s1135_s10 + $0x2a0] sm:$0xff]  ;;  %v522_v6 = vld [vmem:[%s1135_s10 + $0x2b0] sm:$0xff] }
  0x6e   : > { %575 = vmatpush1.msra.mxu0 %v444_v37  ;;  %646 = vmatpush1.msra.mxu1 %v446_v38  ;;  %v517_v7 = vld [vmem:[%s1135_s10 + $0x288] sm:$0xff]  ;;  %v519_v8 = vld [vmem:[%s1135_s10 + $0x298] sm:$0xff]  ;;  %v516_v9 = vld [vmem:[%s1135_s10 + $0x280] sm:$0xff] }
  0x6f   : > { %576 = vmatprep.subr.mxu0 %v441_v39  ;;  %647 = vmatprep.subr.mxu1 %v443_v40  ;;  %v518_v10 = vld [vmem:[%s1135_s10 + $0x290] sm:$0xff]  ;;  %v513_v11 = vld [vmem:[%s1135_s10 + $0x268] sm:$0xff]  ;;  %v515_v12 = vld [vmem:[%s1135_s10 + $0x278] sm:$0xff] }
  0x70   : > { %577 = vmatpush1.msra.mxu0 %v440_v41  ;;  %648 = vmatpush1.msra.mxu1 %v442_v42  ;;  %v512_v13 = vld [vmem:[%s1135_s10 + $0x260] sm:$0xff]  ;;  %v514_v14 = vld [vmem:[%s1135_s10 + $0x270] sm:$0xff]  ;;  %v509_v15 = vld [vmem:[%s1135_s10 + $0x248] sm:$0xff] }
  0x71   : > { %578 = vmatprep.subr.mxu0 %v437_v43  ;;  %649 = vmatprep.subr.mxu1 %v439_v44  ;;  %v511_v16 = vld [vmem:[%s1135_s10 + $0x258] sm:$0xff]  ;;  %v508_v17 = vld [vmem:[%s1135_s10 + $0x240] sm:$0xff]  ;;  %v510_v18 = vld [vmem:[%s1135_s10 + $0x250] sm:$0xff] }
  0x72   : > { %579 = vmatpush1.msra.mxu0 %v436_v45  ;;  %650 = vmatpush1.msra.mxu1 %v438_v46  ;;  %v505_v19 = vld [vmem:[%s1135_s10 + $0x228] sm:$0xff]  ;;  %v507_v20 = vld [vmem:[%s1135_s10 + $0x238] sm:$0xff]  ;;  %v504_v21 = vld [vmem:[%s1135_s10 + $0x220] sm:$0xff] }
  0x73   : > { %590 = vmatprep.subr.mxu0 %v541_v47  ;;  %661 = vmatprep.subr.mxu1 %v543_v48  ;;  %v506_v22 = vld [vmem:[%s1135_s10 + $0x230] sm:$0xff]  ;;  %v501_v23 = vld [vmem:[%s1135_s10 + $0x208] sm:$0xff]  ;;  %v503_v24 = vld [vmem:[%s1135_s10 + $0x218] sm:$0xff] }
  0x74   : > { %591 = vmatpush2.msra.mxu0 %v540_v49  ;;  %662 = vmatpush2.msra.mxu1 %v542_v50  ;;  %v500_v25 = vld [vmem:[%s1135_s10 + $0x200] sm:$0xff]  ;;  %v502_v26 = vld [vmem:[%s1135_s10 + $0x210] sm:$0xff] }
  0x75   : > { %592 = vmatprep.subr.mxu0 %v537_v51  ;;  %663 = vmatprep.subr.mxu1 %v539_v52  ;;  %v434_v27 = vld [vmem:[%s1266_s0] sm:$0xff] }
  0x76   : > { %593 = vmatpush2.msra.mxu0 %v536_v53  ;;  %664 = vmatpush2.msra.mxu1 %v538_v54  ;;  %v700_v28 = vld [vmem:[%s1269_s3] sm:$0xff] }
  0x77   : > { %594 = vmatprep.subr.mxu0 %v533_v55  ;;  %665 = vmatprep.subr.mxu1 %v535_v56 }
  0x78   : > { %595 = vmatpush2.msra.mxu0 %v532_v57  ;;  %666 = vmatpush2.msra.mxu1 %v534_v58 }
  0x79   : > { %596 = vmatprep.subr.mxu0 %v529_v59  ;;  %667 = vmatprep.subr.mxu1 %v531_v60 }
  0x7a   : > { %597 = vmatpush2.msra.mxu0 %v528_v61  ;;  %668 = vmatpush2.msra.mxu1 %v530_v62 }
  0x7b   : > { %598 = vmatprep.subr.mxu0 %v525_v63  ;;  %669 = vmatprep.subr.mxu1 %v527_v0 }
  0x7c   : > { %599 = vmatpush2.msra.mxu0 %v524_v1  ;;  %670 = vmatpush2.msra.mxu1 %v526_v2 }
  0x7d   : > { %600 = vmatprep.subr.mxu0 %v521_v3  ;;  %671 = vmatprep.subr.mxu1 %v523_v4 }
  0x7e   : > { %601 = vmatpush2.msra.mxu0 %v520_v5  ;;  %672 = vmatpush2.msra.mxu1 %v522_v6 }
  0x7f   : > { %602 = vmatprep.subr.mxu0 %v517_v7  ;;  %673 = vmatprep.subr.mxu1 %v519_v8 }
  0x80   : > { %603 = vmatpush2.msra.mxu0 %v516_v9  ;;  %674 = vmatpush2.msra.mxu1 %v518_v10 }
  0x81   : > { %604 = vmatprep.subr.mxu0 %v513_v11  ;;  %675 = vmatprep.subr.mxu1 %v515_v12 }
  0x82   : > { %605 = vmatpush2.msra.mxu0 %v512_v13  ;;  %676 = vmatpush2.msra.mxu1 %v514_v14 }
  0x83   : > { %606 = vmatprep.subr.mxu0 %v509_v15  ;;  %677 = vmatprep.subr.mxu1 %v511_v16 }
  0x84   : > { %607 = vmatpush2.msra.mxu0 %v508_v17  ;;  %678 = vmatpush2.msra.mxu1 %v510_v18 }
  0x85   : > { %608 = vmatprep.subr.mxu0 %v505_v19  ;;  %679 = vmatprep.subr.mxu1 %v507_v20 }
  0x86   : > { %609 = vmatpush2.msra.mxu0 %v504_v21  ;;  %680 = vmatpush2.msra.mxu1 %v506_v22 }
  0x87   : > { %610 = vmatprep.subr.mxu0 %v501_v23  ;;  %681 = vmatprep.subr.mxu1 %v503_v24 }
  0x88   : > { %611 = vmatpush2.msra.mxu0 %v500_v25  ;;  %682 = vmatpush2.msra.mxu1 %v502_v26 }
  0x89   : > { %613 = vmatmul.mubr.f32.vlgmr.msra.gmra.mxu0 %v434_v27  ;;  %684 = vmatmul.mubr.f32.vlgmr.msra.gmra.mxu1 %v434_v27 }
  0x8a   : > { %703 = vperm.xlu0 %821, %v700_v28  }
  0xce   : > { %v694_v29 = vpop.permute.xlu0 %693 }
 0x105   : > { %v704_v32 = vpop.permute.xlu0 %703 }
 0x149   : > { %v614_v30 = vpop.f32.mrf.mxu0  ;;  %v685_v31 = vpop.f32.mrf.mxu1 }
 0x14a   : > { %v696_v33 = vmul.f32 %v694_v29, %v614_v30  ;;  %v698_v34 = vmul.f32 %v694_v29, %v685_v31 }
 0x14b   : > { %v616_v35 = vpop.f32.mrf.mxu0  ;;  %v687_v36 = vpop.f32.mrf.mxu1 }
 0x14c   : > { %v706_v37 = vadd.f32 %v704_v32, %v696_v33  ;;  %v697_v38 = vmul.f32 %v694_v29, %v616_v35  ;;  %v699_v39 = vmul.f32 %v694_v29, %v687_v36  ;;  %v708_v40 = vadd.f32 %v704_v32, %v698_v34 }
 0x14e   : > { %v710_v41 = vmax.f32 %v706_v37, 0.0  ;;  %v707_v42 = vadd.f32 %v704_v32, %v697_v38  ;;  %v709_v43 = vadd.f32 %v704_v32, %v699_v39  ;;  %v712_v45 = vmax.f32 %v708_v40, 0.0 }
 0x150   : > { %714 = vst [vmem:[%s432_s24] sm:$0xff] %v710_v41  ;;  %v711_v44 = vmax.f32 %v707_v42, 0.0  ;;  %v713_v46 = vmax.f32 %v709_v43, 0.0  ;;  %716 = vst [vmem:[%s432_s24 + $0x10] sm:$0xff] %v712_v45 }
 0x152   : > { %715 = vst [vmem:[%s432_s24 + $0x8] sm:$0xff] %v711_v44  ;;  %717 = vst [vmem:[%s432_s24 + $0x18] sm:$0xff] %v713_v46 }
 0x153 PF: > { %p11_p9 = scmp.ge.s32.totalorder %s889_s19, 4   ;;  %s1271_s15 = smov %s840_s16 }
 0x154   : > { %s1272_s16 = smov %s898_s22  ;;  %s1273_s17 = smov %s889_s19 }
 0x155   :  { %13 = sbr.rel (!%p11_p9) target bundleno = 2 (0x2), region = 94 }

</bundles_post_ra>
